<compile_context>
chip_gen: v7x
topology: tpu7x:2x2x1
jax: 0.10.0
libtpu: 0.0.40
codegen_flags: <defaults>
</compile_context>

<pallas_src>
import functools
import math

import jax
import jax.numpy as jnp
from jax.experimental import pallas as pl
from jax.experimental.pallas import tpu as pltpu


# --------------------------------------------------------------------------
# generation-aware tuning knobs
# --------------------------------------------------------------------------

def _detect_vmem_capacity():
    try:
        return int(pltpu.get_tpu_info().vmem_capacity_bytes)
    except Exception:
        return 64 * 1024 * 1024      # conservative fallback (treat as v7x-class)


_VMEM_CAP = _detect_vmem_capacity()
_BIG_VMEM = _VMEM_CAP >= 100 * 1024 * 1024          # True on v5e/v6e (128 MiB), False on v7x (64 MiB)
_VMEM_LIMIT = (64 if _BIG_VMEM else 32) * 1024 * 1024

_TM_TARGET = 512 if _BIG_VMEM else 256
_TN_TARGET = 1024 if _BIG_VMEM else 512
_TK_TARGET = 1024 if _BIG_VMEM else 512
_TQ_TARGET = 256
_TKV_TARGET = 512 if _BIG_VMEM else 256


def _round_up(x, m):
    return ((x + m - 1) // m) * m


def _tile(dim, target, granule):
    """Largest multiple of `granule` dividing `dim` and <= target, else the full dim.

    Guarantees block last-two-dims are either multiples of (8,128) or the full extent.
    """
    if dim <= target:
        return dim
    t = (target // granule) * granule
    while t >= granule:
        if dim % t == 0:
            return t
        t -= granule
    return dim


# --------------------------------------------------------------------------
# shared layernorm math (f32)
# --------------------------------------------------------------------------

def _ln_math(x, g, b, eps):
    mu = jnp.mean(x, axis=-1, keepdims=True)
    var = jnp.mean(jnp.square(x - mu), axis=-1, keepdims=True)
    return (x - mu) * jax.lax.rsqrt(var + eps) * g + b


# --------------------------------------------------------------------------
# generic tiled linear (bias + optional GELU), bf16 operands, f32 accumulation
# --------------------------------------------------------------------------

def _linear_kernel(x_ref, w_ref, b_ref, o_ref, acc_ref, *, activation):
    k = pl.program_id(2)

    @pl.when(k == 0)
    def _():
        acc_ref[...] = jnp.zeros_like(acc_ref)

    acc_ref[...] += jnp.dot(
        x_ref[...].astype(jnp.bfloat16),
        w_ref[...].astype(jnp.bfloat16),
        preferred_element_type=jnp.float32,
    )

    @pl.when(k == pl.num_programs(2) - 1)
    def _():
        y = acc_ref[...] + b_ref[...]
        if activation == "gelu":
            # exact (erf) GELU, matching HF BERT "gelu"; rides the EUP slot.
            y = 0.5 * y * (1.0 + jax.lax.erf(y * (1.0 / math.sqrt(2.0))))
        o_ref[...] = y.astype(o_ref.dtype)


def linear(x, w, b, activation=None, out_dtype=jnp.bfloat16):
    """x: (M, K), w: (K, N) bf16, b: (N,) f32 -> (M, N) out_dtype."""
    M, K = x.shape
    N = w.shape[1]
    tm = _tile(M, _TM_TARGET, 8)
    tn = _tile(N, _TN_TARGET, 128)
    tk = _tile(K, _TK_TARGET, 128)
    grid = (M // tm, N // tn, K // tk)
    kernel = functools.partial(_linear_kernel, activation=activation)
    return pl.pallas_call(
        kernel,
        grid=grid,
        in_specs=[
            pl.BlockSpec((tm, tk), lambda i, j, k: (i, k)),
            pl.BlockSpec((tk, tn), lambda i, j, k: (k, j)),
            pl.BlockSpec((1, tn), lambda i, j, k: (0, j)),
        ],
        out_specs=pl.BlockSpec((tm, tn), lambda i, j, k: (i, j)),
        out_shape=jax.ShapeDtypeStruct((M, N), out_dtype),
        scratch_shapes=[pltpu.VMEM((tm, tn), jnp.float32)],
        compiler_params=pltpu.CompilerParams(
            dimension_semantics=("parallel", "parallel", "arbitrary"),
            vmem_limit_bytes=_VMEM_LIMIT,
        ),
    )(x, w, b.reshape(1, N))


# --------------------------------------------------------------------------
# fused QKV projection: writes (3, M, H) bf16 planes so attention DMAs only what it needs
# --------------------------------------------------------------------------

def _qkv_linear_kernel(x_ref, w_ref, b_ref, o_ref, acc_ref, *, hidden):
    k = pl.program_id(1)

    @pl.when(k == 0)
    def _():
        acc_ref[...] = jnp.zeros_like(acc_ref)

    acc_ref[...] += jnp.dot(
        x_ref[...].astype(jnp.bfloat16),
        w_ref[...].astype(jnp.bfloat16),
        preferred_element_type=jnp.float32,
    )

    @pl.when(k == pl.num_programs(1) - 1)
    def _():
        y = acc_ref[...] + b_ref[...]                      # (tm, 3H)
        for part in range(3):                              # Q / K / V planes
            o_ref[part] = y[:, part * hidden:(part + 1) * hidden].astype(o_ref.dtype)


def qkv_linear(x, w, b, hidden):
    """x: (M, K), w: (K, 3H) bf16, b: (3H,) f32 -> (3, M, H) bf16 [Q|K|V planes]."""
    M, K = x.shape
    N = w.shape[1]                                         # 3H
    tm = _tile(M, _TM_TARGET, 8)
    tk = _tile(K, _TK_TARGET, 128)
    grid = (M // tm, K // tk)
    return pl.pallas_call(
        functools.partial(_qkv_linear_kernel, hidden=hidden),
        grid=grid,
        in_specs=[
            pl.BlockSpec((tm, tk), lambda i, k: (i, k)),
            pl.BlockSpec((tk, N), lambda i, k: (k, 0)),
            pl.BlockSpec((1, N), lambda i, k: (0, 0)),
        ],
        out_specs=pl.BlockSpec((3, tm, hidden), lambda i, k: (0, i, 0)),
        out_shape=jax.ShapeDtypeStruct((3, M, hidden), jnp.bfloat16),
        scratch_shapes=[pltpu.VMEM((tm, N), jnp.float32)],
        compiler_params=pltpu.CompilerParams(
            dimension_semantics=("parallel", "arbitrary"),
            vmem_limit_bytes=_VMEM_LIMIT,
        ),
    )(x, w, b.reshape(1, N))


# --------------------------------------------------------------------------
# linear (full-N tile) with bias + residual + LayerNorm fused into the epilogue
# --------------------------------------------------------------------------

def _linear_add_ln_kernel(x_ref, w_ref, b_ref, r_ref, g_ref, bt_ref, o_ref, acc_ref, *, eps):
    k = pl.program_id(1)

    @pl.when(k == 0)
    def _():
        acc_ref[...] = jnp.zeros_like(acc_ref)

    acc_ref[...] += jnp.dot(
        x_ref[...].astype(jnp.bfloat16),
        w_ref[...].astype(jnp.bfloat16),
        preferred_element_type=jnp.float32,
    )

    @pl.when(k == pl.num_programs(1) - 1)
    def _():
        z = acc_ref[...] + b_ref[...] + r_ref[...].astype(jnp.float32)
        o_ref[...] = _ln_math(z, g_ref[...], bt_ref[...], eps).astype(o_ref.dtype)


def linear_bias_add_ln(x, w, b, resid, gamma, beta, eps=1e-12, out_dtype=jnp.bfloat16):
    """LayerNorm(resid + x @ w + b).  Requires full-N tile (N = hidden size)."""
    M, K = x.shape
    N = w.shape[1]
    tm = _tile(M, _TM_TARGET, 8)
    tk = _tile(K, _TK_TARGET, 128)
    grid = (M // tm, K // tk)
    kernel = functools.partial(_linear_add_ln_kernel, eps=eps)
    return pl.pallas_call(
        kernel,
        grid=grid,
        in_specs=[
            pl.BlockSpec((tm, tk), lambda i, k: (i, k)),
            pl.BlockSpec((tk, N), lambda i, k: (k, 0)),
            pl.BlockSpec((1, N), lambda i, k: (0, 0)),
            pl.BlockSpec((tm, N), lambda i, k: (i, 0)),
            pl.BlockSpec((1, N), lambda i, k: (0, 0)),
            pl.BlockSpec((1, N), lambda i, k: (0, 0)),
        ],
        out_specs=pl.BlockSpec((tm, N), lambda i, k: (i, 0)),
        out_shape=jax.ShapeDtypeStruct((M, N), out_dtype),
        scratch_shapes=[pltpu.VMEM((tm, N), jnp.float32)],
        compiler_params=pltpu.CompilerParams(
            dimension_semantics=("parallel", "arbitrary"),
            vmem_limit_bytes=_VMEM_LIMIT,
        ),
    )(x, w, b.reshape(1, N), resid, gamma.reshape(1, N), beta.reshape(1, N))


# --------------------------------------------------------------------------
# standalone layernorm (embeddings)
# --------------------------------------------------------------------------

def _ln_kernel(x_ref, g_ref, b_ref, o_ref, *, eps):
    o_ref[...] = _ln_math(x_ref[...].astype(jnp.float32),
                          g_ref[...], b_ref[...], eps).astype(o_ref.dtype)


def layernorm(x, gamma, beta, eps=1e-12, out_dtype=jnp.bfloat16):
    M, H = x.shape
    tm = _tile(M, _TM_TARGET, 8)
    kernel = functools.partial(_ln_kernel, eps=eps)
    return pl.pallas_call(
        kernel,
        grid=(M // tm,),
        in_specs=[
            pl.BlockSpec((tm, H), lambda i: (i, 0)),
            pl.BlockSpec((1, H), lambda i: (0, 0)),
            pl.BlockSpec((1, H), lambda i: (0, 0)),
        ],
        out_specs=pl.BlockSpec((tm, H), lambda i: (i, 0)),
        out_shape=jax.ShapeDtypeStruct((M, H), out_dtype),
        compiler_params=pltpu.CompilerParams(
            dimension_semantics=("parallel",), vmem_limit_bytes=_VMEM_LIMIT),
    )(x, gamma.reshape(1, H), beta.reshape(1, H))


# --------------------------------------------------------------------------
# flash-style attention over the (3, M, H) QKV planes (lane-dense accumulator)
# --------------------------------------------------------------------------

def _attn_kernel(q_ref, k_ref, v_ref, bias_ref, o_ref, m_sc, l_sc, acc_sc,
                 *, num_heads, head_dim):
    ki = pl.program_id(2)

    @pl.when(ki == 0)
    def _():
        m_sc[...] = jnp.full(m_sc.shape, -jnp.inf, dtype=jnp.float32)
        l_sc[...] = jnp.zeros_like(l_sc)
        acc_sc[...] = jnp.zeros_like(acc_sc)

    bias = bias_ref[0]                    # (1, tkv) additive mask, broadcast over q rows
    qb = q_ref[0]                         # (tq,  H) bf16 (1/sqrt(d) folded into W_q)
    kb = k_ref[0]                         # (tkv, H) bf16
    vb = v_ref[0]                         # (tkv, H) bf16

    # static unroll over heads; all per-head ops are plain 2-D (no in-kernel transposes)
    for h in range(num_heads):
        lo, hi = h * head_dim, (h + 1) * head_dim
        s = jnp.einsum("qd,kd->qk", qb[:, lo:hi], kb[:, lo:hi],
                       preferred_element_type=jnp.float32)            # (tq, tkv)
        s = s + bias

        m_prev = m_sc[:, h:h + 1]                                      # (tq, 1)
        m_new = jnp.maximum(m_prev, jnp.max(s, axis=-1, keepdims=True))
        alpha = jnp.exp(m_prev - m_new)
        p = jnp.exp(s - m_new)                                         # (tq, tkv) f32
        l_sc[:, h:h + 1] = alpha * l_sc[:, h:h + 1] + jnp.sum(p, axis=-1, keepdims=True)
        acc_sc[:, lo:hi] = alpha * acc_sc[:, lo:hi] + jnp.dot(
            p.astype(jnp.bfloat16), vb[:, lo:hi],
            preferred_element_type=jnp.float32)
        m_sc[:, h:h + 1] = m_new

    @pl.when(ki == pl.num_programs(2) - 1)
    def _():
        for h in range(num_heads):
            lo, hi = h * head_dim, (h + 1) * head_dim
            inv = pl.reciprocal(l_sc[:, h:h + 1], approx=False)        # exact (epilogue only)
            o_ref[:, lo:hi] = (acc_sc[:, lo:hi] * inv).astype(o_ref.dtype)


def attention(qkv3d, mask_bias3d, B, S, num_heads, head_dim):
    """qkv3d: (3, B*S, H) bf16 planes, mask_bias3d: (B, 1, S) additive -> (B*S, H) bf16."""
    H = num_heads * head_dim
    M = B * S
    tq = _tile(S, _TQ_TARGET, 8)
    tkv = _tile(S, _TKV_TARGET, 128)
    nq = S // tq
    nk = S // tkv
    kernel = functools.partial(_attn_kernel, num_heads=num_heads, head_dim=head_dim)
    return pl.pallas_call(
        kernel,
        grid=(B, nq, nk),
        in_specs=[
            pl.BlockSpec((1, tq, H), lambda b, qi, ki: (0, b * nq + qi, 0)),   # Q rows only
            pl.BlockSpec((1, tkv, H), lambda b, qi, ki: (1, b * nk + ki, 0)),  # K rows only
            pl.BlockSpec((1, tkv, H), lambda b, qi, ki: (2, b * nk + ki, 0)),  # V rows only
            pl.BlockSpec((1, 1, tkv), lambda b, qi, ki: (b, 0, ki)),           # compact mask
        ],
        out_specs=pl.BlockSpec((tq, H), lambda b, qi, ki: (b * nq + qi, 0)),
        out_shape=jax.ShapeDtypeStruct((M, H), jnp.bfloat16),
        scratch_shapes=[
            pltpu.VMEM((tq, num_heads), jnp.float32),   # running max (head on lane axis)
            pltpu.VMEM((tq, num_heads), jnp.float32),   # running sum
            pltpu.VMEM((tq, H), jnp.float32),           # lane-dense running output
        ],
        compiler_params=pltpu.CompilerParams(
            dimension_semantics=("parallel", "parallel", "arbitrary"),
            vmem_limit_bytes=_VMEM_LIMIT,
        ),
    )(qkv3d, qkv3d, qkv3d, mask_bias3d)


# --------------------------------------------------------------------------
# token-level cross-entropy over the lane-padded (N, 128) logits slab
# --------------------------------------------------------------------------

def _ce_kernel(logits_ref, labels_ref, valid_ref, loss_ref, tot_sc, cnt_sc, *, num_labels):
    i = pl.program_id(0)

    @pl.when(i == 0)
    def _():
        tot_sc[...] = jnp.zeros_like(tot_sc)
        cnt_sc[...] = jnp.zeros_like(cnt_sc)

    logits = logits_ref[...]                # (tm, Cpad) lane-dense f32
    labels = labels_ref[...]                # (tm, 1) int32
    valid = valid_ref[...]                  # (tm, 1) f32

    col = jax.lax.broadcasted_iota(jnp.int32, logits.shape, 1)
    real = col < num_labels                 # exclude lane-padding columns from the LSE
    masked = jnp.where(real, logits, -1e30)
    m = jnp.max(masked, axis=-1, keepdims=True)
    lse = jnp.log(jnp.sum(jnp.exp(masked - m), axis=-1, keepdims=True)) + m
    onehot = jnp.where((col == labels) & real, 1.0, 0.0)
    picked = jnp.sum(onehot * logits, axis=-1, keepdims=True)
    nll = (lse - picked) * valid            # (tm, 1)

    tot_sc[...] += jnp.sum(nll, keepdims=True)
    cnt_sc[...] += jnp.sum(valid, keepdims=True)

    @pl.when(i == pl.num_programs(0) - 1)
    def _():
        # matches torch CrossEntropyLoss(mean): 0/0 -> NaN when no valid labels
        loss_ref[...] = tot_sc[...] / cnt_sc[...]


def token_ce_loss(logits_pad, labels1d, valid1d, *, num_labels):
    M, Cpad = logits_pad.shape
    tm = _tile(M, _TM_TARGET, 8)
    kernel = functools.partial(_ce_kernel, num_labels=num_labels)
    out = pl.pallas_call(
        kernel,
        grid=(M // tm,),
        in_specs=[
            pl.BlockSpec((tm, Cpad), lambda i: (i, 0)),
            pl.BlockSpec((tm, 1), lambda i: (i, 0)),
            pl.BlockSpec((tm, 1), lambda i: (i, 0)),
        ],
        out_specs=pl.BlockSpec((1, 1), lambda i: (0, 0)),
        out_shape=jax.ShapeDtypeStruct((1, 1), jnp.float32),
        scratch_shapes=[pltpu.VMEM((1, 1), jnp.float32),
                        pltpu.VMEM((1, 1), jnp.float32)],
        compiler_params=pltpu.CompilerParams(
            dimension_semantics=("arbitrary",), vmem_limit_bytes=_VMEM_LIMIT),
    )(logits_pad,
      labels1d.reshape(M, 1).astype(jnp.int32),
      valid1d.reshape(M, 1).astype(jnp.float32))
    return out[0, 0]


# --------------------------------------------------------------------------
# BERT-for-token-classification forward (glue in plain JAX, compute in Pallas)
# --------------------------------------------------------------------------

CONFIG = dict(
    vocab_size=100,
    hidden_size=32,
    num_layers=2,
    num_heads=2,
    intermediate_size=64,
    max_position=64,
    type_vocab_size=2,
    num_labels=18,
)


def init_params(key, cfg):
    H = cfg["hidden_size"]
    I = cfg["intermediate_size"]
    L = cfg["num_labels"]
    head_dim = H // cfg["num_heads"]
    scale = 1.0 / math.sqrt(head_dim)
    Lpad = _round_up(L, 128)   # lane-dense classifier slab

    def nrm(k, shape, s=0.02):
        return s * jax.random.normal(k, shape, dtype=jnp.float32)

    keys = iter(jax.random.split(key, 8 + cfg["num_layers"] * 8))
    p = {
        "word_emb": nrm(next(keys), (cfg["vocab_size"], H)),
        "pos_emb": nrm(next(keys), (cfg["max_position"], H)),
        "type_emb": nrm(next(keys), (cfg["type_vocab_size"], H)),
        "emb_ln_g": jnp.ones((H,), jnp.float32),
        "emb_ln_b": jnp.zeros((H,), jnp.float32),
        # classifier padded 18 -> 128 lanes; padded columns excluded from the CE LSE.
        "cls_w": jnp.pad(nrm(next(keys), (H, L)), ((0, 0), (0, Lpad - L))).astype(jnp.bfloat16),
        "cls_b": jnp.zeros((Lpad,), jnp.float32),
        "layers": [],
    }
    for _ in range(cfg["num_layers"]):
        qkv_w = nrm(next(keys), (H, 3 * H))
        # fold the attention 1/sqrt(head_dim) scale into the Q projection weights
        # (and bias — zero here) so the attention kernel never rescales scores.
        qkv_w = qkv_w.at[:, :H].multiply(scale)
        lp = {
            "qkv_w": qkv_w.astype(jnp.bfloat16),
            "qkv_b": jnp.zeros((3 * H,), jnp.float32),
            "o_w": nrm(next(keys), (H, H)).astype(jnp.bfloat16),
            "o_b": jnp.zeros((H,), jnp.float32),
            "ln1_g": jnp.ones((H,), jnp.float32), "ln1_b": jnp.zeros((H,), jnp.float32),
            "i_w": nrm(next(keys), (H, I)).astype(jnp.bfloat16),
            "i_b": jnp.zeros((I,), jnp.float32),
            "out_w": nrm(next(keys), (I, H)).astype(jnp.bfloat16),
            "out_b": jnp.zeros((H,), jnp.float32),
            "ln2_g": jnp.ones((H,), jnp.float32), "ln2_b": jnp.zeros((H,), jnp.float32),
        }
        p["layers"].append(lp)
    return p


def bert_layer(h2d, mask_bias3d, lp, B, S, num_heads, head_dim):
    H = num_heads * head_dim
    qkv = qkv_linear(h2d, lp["qkv_w"], lp["qkv_b"], H)                 # (3, B*S, H) bf16
    ctx = attention(qkv, mask_bias3d, B, S, num_heads, head_dim)       # (B*S, H) bf16
    # attention output projection + residual + LayerNorm fused into one kernel
    h2d = linear_bias_add_ln(ctx, lp["o_w"], lp["o_b"], h2d, lp["ln1_g"], lp["ln1_b"])
    ffn = linear(h2d, lp["i_w"], lp["i_b"], activation="gelu")         # (B*S, I) bf16
    # FFN down projection + residual + LayerNorm fused into one kernel
    h2d = linear_bias_add_ln(ffn, lp["out_w"], lp["out_b"], h2d, lp["ln2_g"], lp["ln2_b"])
    return h2d


def bert_token_classification_forward(params, ids, mask, labels, cfg=CONFIG):
    B, S = ids.shape
    H = cfg["hidden_size"]
    num_heads = cfg["num_heads"]
    head_dim = H // num_heads
    L = cfg["num_labels"]

    # ---- embeddings (gather has no clean Pallas equivalent; kept as XLA glue)
    # TODO(synk): embedding gather (jnp.take) stays in XLA.
    word = jnp.take(params["word_emb"], ids, axis=0)                   # (B, S, H)
    pos = params["pos_emb"][:S][None, :, :]                            # (1, S, H)
    typ = params["type_emb"][0][None, None, :]                         # token_type_ids = 0
    emb = (word + pos + typ).reshape(B * S, H)
    h2d = layernorm(emb, params["emb_ln_g"], params["emb_ln_b"])       # (B*S, H) bf16

    # ---- attention mask kept compact: (B, 1, S) additive bias, broadcast in-kernel
    maskf = mask.astype(jnp.float32)
    mask_bias3d = ((1.0 - maskf) * -10000.0)[:, None, :]               # (B, 1, S)

    # ---- encoder layers (dropout = identity at eval)
    for lp in params["layers"]:
        h2d = bert_layer(h2d, mask_bias3d, lp, B, S, num_heads, head_dim)

    # ---- classifier head; lane-dense 128-wide logits slab in f32
    logits_pad = linear(h2d, params["cls_w"], params["cls_b"], out_dtype=jnp.float32)
    logits = logits_pad[:, :L].reshape(B, S, L)

    # ---- token-level cross-entropy (HF semantics: only labels == -100 ignored)
    labels1d = labels.reshape(B * S).astype(jnp.int32)
    valid = (labels1d != -100).astype(jnp.float32)
    loss = token_ce_loss(logits_pad, labels1d, valid, num_labels=L)

    return loss, logits  # mirrors HF (loss, logits) output tuple


# --------------------------------------------------------------------------

if __name__ == "__main__":
    key = jax.random.PRNGKey(0)
    kp, ki, kl = jax.random.split(key, 3)

    B, S = 2, 8
    params = init_params(kp, CONFIG)

    ids = jax.random.randint(ki, (B, S), 0, CONFIG["vocab_size"], dtype=jnp.int32)
    # second sequence padded at the last 2 positions
    seq_lens = jnp.array([[S], [S - 2]], dtype=jnp.int32)
    mask = (jnp.arange(S)[None, :] < seq_lens).astype(jnp.int32)
    labels = jax.random.randint(kl, (B, S), 0, CONFIG["num_labels"], dtype=jnp.int32)

    fwd = jax.jit(bert_token_classification_forward)
    loss, logits = fwd(params, ids, mask, labels)
    jax.block_until_ready((loss, logits))

    assert logits.shape == (B, S, CONFIG["num_labels"])
    assert loss.shape == ()
    assert bool(jnp.isfinite(loss))
    print("KERNEL_OK")
</pallas_src>

<mosaic_0001>
module attributes {stable_mosaic.version = 11 : i64} {
  func.func @_ln_kernel(%arg0: i32, %arg1: memref<16x32xf32, #tpu.memory_space<vmem>>, %arg2: memref<1x32xf32, #tpu.memory_space<vmem>>, %arg3: memref<1x32xf32, #tpu.memory_space<vmem>>, %arg4: memref<16x32xbf16, #tpu.memory_space<vmem>>) attributes {dimension_semantics = [#tpu.dimension_semantics<parallel>], iteration_bounds = array<i64: 1>, scalar_prefetch = 0 : i64, scratch_operands = 0 : i64, tpu.core_type = #tpu.core_type<tc>, window_params = [{transform_indices = @transform_0, window_bounds = array<i64: 16, 32>}, {pipeline_mode = #tpu.pipeline_mode<synchronous>, transform_indices = @transform_1, window_bounds = array<i64: 1, 32>}, {pipeline_mode = #tpu.pipeline_mode<synchronous>, transform_indices = @transform_2, window_bounds = array<i64: 1, 32>}, {transform_indices = @transform_3, window_bounds = array<i64: 16, 32>}]} {
    %c0 = arith.constant 0 : index
    %c0_0 = arith.constant 0 : index
    %0 = vector.load %arg1[%c0, %c0_0] : memref<16x32xf32, #tpu.memory_space<vmem>>, vector<16x32xf32>
    %c0_1 = arith.constant 0 : index
    %c0_2 = arith.constant 0 : index
    %1 = vector.load %arg2[%c0_1, %c0_2] : memref<1x32xf32, #tpu.memory_space<vmem>>, vector<1x32xf32>
    %c0_3 = arith.constant 0 : index
    %c0_4 = arith.constant 0 : index
    %2 = vector.load %arg3[%c0_3, %c0_4] : memref<1x32xf32, #tpu.memory_space<vmem>>, vector<1x32xf32>
    %cst = arith.constant dense<0.000000e+00> : vector<16xf32>
    %3 = vector.multi_reduction <add>, %0, %cst [1] : vector<16x32xf32> to vector<16xf32>
    %4 = vector.shape_cast %3 : vector<16xf32> to vector<16x1xf32>
    %cst_5 = arith.constant 3.200000e+01 : f32
    %5 = vector.broadcast %cst_5 : f32 to vector<16x1xf32>
    %6 = arith.divf %4, %5 : vector<16x1xf32>
    %7 = vector.broadcast %6 : vector<16x1xf32> to vector<16x32xf32>
    %8 = arith.subf %0, %7 : vector<16x32xf32>
    %9 = arith.mulf %8, %8 : vector<16x32xf32>
    %cst_6 = arith.constant dense<0.000000e+00> : vector<16xf32>
    %10 = vector.multi_reduction <add>, %9, %cst_6 [1] : vector<16x32xf32> to vector<16xf32>
    %11 = vector.shape_cast %10 : vector<16xf32> to vector<16x1xf32>
    %cst_7 = arith.constant 3.200000e+01 : f32
    %12 = vector.broadcast %cst_7 : f32 to vector<16x1xf32>
    %13 = arith.divf %11, %12 : vector<16x1xf32>
    %14 = vector.broadcast %6 : vector<16x1xf32> to vector<16x32xf32>
    %15 = arith.subf %0, %14 : vector<16x32xf32>
    %cst_8 = arith.constant 9.99999996E-13 : f32
    %16 = vector.broadcast %cst_8 : f32 to vector<16x1xf32>
    %17 = arith.addf %13, %16 : vector<16x1xf32>
    %18 = math.rsqrt %17 : vector<16x1xf32>
    %19 = vector.broadcast %18 : vector<16x1xf32> to vector<16x32xf32>
    %20 = arith.mulf %15, %19 : vector<16x32xf32>
    %21 = vector.broadcast %1 : vector<1x32xf32> to vector<16x32xf32>
    %22 = arith.mulf %20, %21 : vector<16x32xf32>
    %23 = vector.broadcast %2 : vector<1x32xf32> to vector<16x32xf32>
    %24 = arith.addf %22, %23 : vector<16x32xf32>
    %25 = arith.truncf %24 : vector<16x32xf32> to vector<16x32xbf16>
    %c0_9 = arith.constant 0 : index
    %c0_10 = arith.constant 0 : index
    %26 = vector.load %arg4[%c0_9, %c0_10] : memref<16x32xbf16, #tpu.memory_space<vmem>>, vector<16x32xbf16>
    tpu.vector_store %arg4[%c0_9, %c0_10], %25 {strides = array<i32>} : memref<16x32xbf16, #tpu.memory_space<vmem>>, vector<16x32xbf16>,
    return
  }
  func.func @transform_0(%arg0: i32) -> (i32, i32) {
    %c0_i32 = arith.constant 0 : i32
    %c0_i32_0 = arith.constant 0 : i32
    return %arg0, %c0_i32 : i32, i32
  }
  func.func @transform_1(%arg0: i32) -> (i32, i32) {
    %c0_i32 = arith.constant 0 : i32
    %c0_i32_0 = arith.constant 0 : i32
    %c0_i32_1 = arith.constant 0 : i32
    return %c0_i32, %c0_i32_0 : i32, i32
  }
  func.func @transform_2(%arg0: i32) -> (i32, i32) {
    %c0_i32 = arith.constant 0 : i32
    %c0_i32_0 = arith.constant 0 : i32
    %c0_i32_1 = arith.constant 0 : i32
    return %c0_i32, %c0_i32_0 : i32, i32
  }
  func.func @transform_3(%arg0: i32) -> (i32, i32) {
    %c0_i32 = arith.constant 0 : i32
    %c0_i32_0 = arith.constant 0 : i32
    return %arg0, %c0_i32 : i32, i32
  }
}

module attributes {stable_mosaic.version = 11 : i64} {
  func.func @_qkv_linear_kernel(%arg0: i32, %arg1: i32, %arg2: memref<16x32xbf16, #tpu.memory_space<vmem>>, %arg3: memref<32x96xbf16, #tpu.memory_space<vmem>>, %arg4: memref<1x96xf32, #tpu.memory_space<vmem>>, %arg5: memref<3x16x32xbf16, #tpu.memory_space<vmem>>, %arg6: memref<16x96xf32, #tpu.memory_space<vmem>>) attributes {dimension_semantics = [#tpu.dimension_semantics<parallel>, #tpu.dimension_semantics<arbitrary>], iteration_bounds = array<i64: 1, 1>, scalar_prefetch = 0 : i64, scratch_operands = 1 : i64, tpu.core_type = #tpu.core_type<tc>, window_params = [{transform_indices = @transform_0, window_bounds = array<i64: 16, 32>}, {transform_indices = @transform_1, window_bounds = array<i64: 32, 96>}, {pipeline_mode = #tpu.pipeline_mode<synchronous>, transform_indices = @transform_2, window_bounds = array<i64: 1, 96>}, {transform_indices = @transform_3, window_bounds = array<i64: 3, 16, 32>}]} {
    %c0_i32 = arith.constant 0 : i32
    %0 = arith.cmpi eq, %arg1, %c0_i32 : i32
    %1 = arith.extui %0 : i1 to i32
    %c0_i32_0 = arith.constant 0 : i32
    %2 = arith.cmpi ne, %1, %c0_i32_0 : i32
    scf.if %2 {
      %cst_10 = arith.constant 0.000000e+00 : f32
      %12 = vector.broadcast %cst_10 : f32 to vector<16x96xf32>
      %c0_11 = arith.constant 0 : index
      %c0_12 = arith.constant 0 : index
      %13 = vector.load %arg6[%c0_11, %c0_12] : memref<16x96xf32, #tpu.memory_space<vmem>>, vector<16x96xf32>
      tpu.vector_store %arg6[%c0_11, %c0_12], %12 {strides = array<i32>} : memref<16x96xf32, #tpu.memory_space<vmem>>, vector<16x96xf32>,
    } else {
    }
    %c0 = arith.constant 0 : index
    %c0_1 = arith.constant 0 : index
    %3 = vector.load %arg6[%c0, %c0_1] : memref<16x96xf32, #tpu.memory_space<vmem>>, vector<16x96xf32>
    %c0_2 = arith.constant 0 : index
    %c0_3 = arith.constant 0 : index
    %4 = vector.load %arg2[%c0_2, %c0_3] : memref<16x32xbf16, #tpu.memory_space<vmem>>, vector<16x32xbf16>
    %c0_4 = arith.constant 0 : index
    %c0_5 = arith.constant 0 : index
    %5 = vector.load %arg3[%c0_4, %c0_5] : memref<32x96xbf16, #tpu.memory_space<vmem>>, vector<32x96xbf16>
    %cst = arith.constant dense<0.000000e+00> : vector<16x96xf32>
    %6 = tpu.matmul %4, %5, %cst {dimension_numbers = #tpu.dot_dimension_numbers<[1], [0], [0], [1], [0, 0, 1, 1], [], []>} : vector<16x32xbf16>, vector<32x96xbf16>, vector<16x96xf32> -> vector<16x96xf32>
    %7 = arith.addf %3, %6 : vector<16x96xf32>
    %c0_6 = arith.constant 0 : index
    %c0_7 = arith.constant 0 : index
    %8 = vector.load %arg6[%c0_6, %c0_7] : memref<16x96xf32, #tpu.memory_space<vmem>>, vector<16x96xf32>
    tpu.vector_store %arg6[%c0_6, %c0_7], %7 {strides = array<i32>} : memref<16x96xf32, #tpu.memory_space<vmem>>, vector<16x96xf32>,
    %c0_i32_8 = arith.constant 0 : i32
    %9 = arith.cmpi eq, %arg1, %c0_i32_8 : i32
    %10 = arith.extui %9 : i1 to i32
    %c0_i32_9 = arith.constant 0 : i32
    %11 = arith.cmpi ne, %10, %c0_i32_9 : i32
    scf.if %11 {
      %c0_10 = arith.constant 0 : index
      %c0_11 = arith.constant 0 : index
      %12 = vector.load %arg6[%c0_10, %c0_11] : memref<16x96xf32, #tpu.memory_space<vmem>>, vector<16x96xf32>
      %c0_12 = arith.constant 0 : index
      %c0_13 = arith.constant 0 : index
      %13 = vector.load %arg4[%c0_12, %c0_13] : memref<1x96xf32, #tpu.memory_space<vmem>>, vector<1x96xf32>
      %14 = vector.broadcast %13 : vector<1x96xf32> to vector<16x96xf32>
      %15 = arith.addf %12, %14 : vector<16x96xf32>
      %16 = vector.extract_strided_slice %15 {offsets = [0, 0], sizes = [16, 32], strides = [1, 1]} : vector<16x96xf32> to vector<16x32xf32>
      %17 = arith.truncf %16 : vector<16x32xf32> to vector<16x32xbf16>
      %c0_14 = arith.constant 0 : index
      %c0_15 = arith.constant 0 : index
      %c0_16 = arith.constant 0 : index
      %18 = vector.load %arg5[%c0_14, %c0_15, %c0_16] : memref<3x16x32xbf16, #tpu.memory_space<vmem>>, vector<1x16x32xbf16>
      %19 = vector.shape_cast %18 : vector<1x16x32xbf16> to vector<16x32xbf16>
      %20 = vector.shape_cast %17 : vector<16x32xbf16> to vector<1x16x32xbf16>
      tpu.vector_store %arg5[%c0_14, %c0_15, %c0_16], %20 {strides = array<i32>} : memref<3x16x32xbf16, #tpu.memory_space<vmem>>, vector<1x16x32xbf16>,
      %21 = vector.extract_strided_slice %15 {offsets = [0, 32], sizes = [16, 32], strides = [1, 1]} : vector<16x96xf32> to vector<16x32xf32>
      %22 = arith.truncf %21 : vector<16x32xf32> to vector<16x32xbf16>
      %c1 = arith.constant 1 : index
      %c0_17 = arith.constant 0 : index
      %c0_18 = arith.constant 0 : index
      %23 = vector.load %arg5[%c1, %c0_17, %c0_18] : memref<3x16x32xbf16, #tpu.memory_space<vmem>>, vector<1x16x32xbf16>
      %24 = vector.shape_cast %23 : vector<1x16x32xbf16> to vector<16x32xbf16>
      %25 = vector.shape_cast %22 : vector<16x32xbf16> to vector<1x16x32xbf16>
      tpu.vector_store %arg5[%c1, %c0_17, %c0_18], %25 {strides = array<i32>} : memref<3x16x32xbf16, #tpu.memory_space<vmem>>, vector<1x16x32xbf16>,
      %26 = vector.extract_strided_slice %15 {offsets = [0, 64], sizes = [16, 32], strides = [1, 1]} : vector<16x96xf32> to vector<16x32xf32>
      %27 = arith.truncf %26 : vector<16x32xf32> to vector<16x32xbf16>
      %c2 = arith.constant 2 : index
      %c0_19 = arith.constant 0 : index
      %c0_20 = arith.constant 0 : index
      %28 = vector.load %arg5[%c2, %c0_19, %c0_20] : memref<3x16x32xbf16, #tpu.memory_space<vmem>>, vector<1x16x32xbf16>
      %29 = vector.shape_cast %28 : vector<1x16x32xbf16> to vector<16x32xbf16>
      %30 = vector.shape_cast %27 : vector<16x32xbf16> to vector<1x16x32xbf16>
      tpu.vector_store %arg5[%c2, %c0_19, %c0_20], %30 {strides = array<i32>} : memref<3x16x32xbf16, #tpu.memory_space<vmem>>, vector<1x16x32xbf16>,
    } else {
    }
    return
  }
  func.func @transform_0(%arg0: i32, %arg1: i32) -> (i32, i32) {
    %c0_i32 = arith.constant 0 : i32
    return %arg0, %arg1 : i32, i32
  }
  func.func @transform_1(%arg0: i32, %arg1: i32) -> (i32, i32) {
    %c0_i32 = arith.constant 0 : i32
    %c0_i32_0 = arith.constant 0 : i32
    return %arg1, %c0_i32 : i32, i32
  }
  func.func @transform_2(%arg0: i32, %arg1: i32) -> (i32, i32) {
    %c0_i32 = arith.constant 0 : i32
    %c0_i32_0 = arith.constant 0 : i32
    %c0_i32_1 = arith.constant 0 : i32
    return %c0_i32, %c0_i32_0 : i32, i32
  }
  func.func @transform_3(%arg0: i32, %arg1: i32) -> (i32, i32, i32) {
    %c0_i32 = arith.constant 0 : i32
    %c0_i32_0 = arith.constant 0 : i32
    %c0_i32_1 = arith.constant 0 : i32
    return %c0_i32, %arg0, %c0_i32_0 : i32, i32, i32
  }
}

module attributes {stable_mosaic.version = 11 : i64} {
  func.func @_linear_add_ln_kernel(%arg0: i32, %arg1: i32, %arg2: memref<16x32xbf16, #tpu.memory_space<vmem>>, %arg3: memref<32x32xbf16, #tpu.memory_space<vmem>>, %arg4: memref<1x32xf32, #tpu.memory_space<vmem>>, %arg5: memref<16x32xbf16, #tpu.memory_space<vmem>>, %arg6: memref<1x32xf32, #tpu.memory_space<vmem>>, %arg7: memref<1x32xf32, #tpu.memory_space<vmem>>, %arg8: memref<16x32xbf16, #tpu.memory_space<vmem>>, %arg9: memref<16x32xf32, #tpu.memory_space<vmem>>) attributes {dimension_semantics = [#tpu.dimension_semantics<parallel>, #tpu.dimension_semantics<arbitrary>], iteration_bounds = array<i64: 1, 1>, scalar_prefetch = 0 : i64, scratch_operands = 1 : i64, tpu.core_type = #tpu.core_type<tc>, window_params = [{transform_indices = @transform_0, window_bounds = array<i64: 16, 32>}, {transform_indices = @transform_1, window_bounds = array<i64: 32, 32>}, {pipeline_mode = #tpu.pipeline_mode<synchronous>, transform_indices = @transform_2, window_bounds = array<i64: 1, 32>}, {transform_indices = @transform_3, window_bounds = array<i64: 16, 32>}, {pipeline_mode = #tpu.pipeline_mode<synchronous>, transform_indices = @transform_4, window_bounds = array<i64: 1, 32>}, {pipeline_mode = #tpu.pipeline_mode<synchronous>, transform_indices = @transform_5, window_bounds = array<i64: 1, 32>}, {transform_indices = @transform_6, window_bounds = array<i64: 16, 32>}]} {
    %c0_i32 = arith.constant 0 : i32
    %0 = arith.cmpi eq, %arg1, %c0_i32 : i32
    %1 = arith.extui %0 : i1 to i32
    %c0_i32_0 = arith.constant 0 : i32
    %2 = arith.cmpi ne, %1, %c0_i32_0 : i32
    scf.if %2 {
      %cst_10 = arith.constant 0.000000e+00 : f32
      %12 = vector.broadcast %cst_10 : f32 to vector<16x32xf32>
      %c0_11 = arith.constant 0 : index
      %c0_12 = arith.constant 0 : index
      %13 = vector.load %arg9[%c0_11, %c0_12] : memref<16x32xf32, #tpu.memory_space<vmem>>, vector<16x32xf32>
      tpu.vector_store %arg9[%c0_11, %c0_12], %12 {strides = array<i32>} : memref<16x32xf32, #tpu.memory_space<vmem>>, vector<16x32xf32>,
    } else {
    }
    %c0 = arith.constant 0 : index
    %c0_1 = arith.constant 0 : index
    %3 = vector.load %arg9[%c0, %c0_1] : memref<16x32xf32, #tpu.memory_space<vmem>>, vector<16x32xf32>
    %c0_2 = arith.constant 0 : index
    %c0_3 = arith.constant 0 : index
    %4 = vector.load %arg2[%c0_2, %c0_3] : memref<16x32xbf16, #tpu.memory_space<vmem>>, vector<16x32xbf16>
    %c0_4 = arith.constant 0 : index
    %c0_5 = arith.constant 0 : index
    %5 = vector.load %arg3[%c0_4, %c0_5] : memref<32x32xbf16, #tpu.memory_space<vmem>>, vector<32x32xbf16>
    %cst = arith.constant dense<0.000000e+00> : vector<16x32xf32>
    %6 = tpu.matmul %4, %5, %cst {dimension_numbers = #tpu.dot_dimension_numbers<[1], [0], [0], [1], [0, 0, 1, 1], [], []>} : vector<16x32xbf16>, vector<32x32xbf16>, vector<16x32xf32> -> vector<16x32xf32>
    %7 = arith.addf %3, %6 : vector<16x32xf32>
    %c0_6 = arith.constant 0 : index
    %c0_7 = arith.constant 0 : index
    %8 = vector.load %arg9[%c0_6, %c0_7] : memref<16x32xf32, #tpu.memory_space<vmem>>, vector<16x32xf32>
    tpu.vector_store %arg9[%c0_6, %c0_7], %7 {strides = array<i32>} : memref<16x32xf32, #tpu.memory_space<vmem>>, vector<16x32xf32>,
    %c0_i32_8 = arith.constant 0 : i32
    %9 = arith.cmpi eq, %arg1, %c0_i32_8 : i32
    %10 = arith.extui %9 : i1 to i32
    %c0_i32_9 = arith.constant 0 : i32
    %11 = arith.cmpi ne, %10, %c0_i32_9 : i32
    scf.if %11 {
      %c0_10 = arith.constant 0 : index
      %c0_11 = arith.constant 0 : index
      %12 = vector.load %arg9[%c0_10, %c0_11] : memref<16x32xf32, #tpu.memory_space<vmem>>, vector<16x32xf32>
      %c0_12 = arith.constant 0 : index
      %c0_13 = arith.constant 0 : index
      %13 = vector.load %arg4[%c0_12, %c0_13] : memref<1x32xf32, #tpu.memory_space<vmem>>, vector<1x32xf32>
      %14 = vector.broadcast %13 : vector<1x32xf32> to vector<16x32xf32>
      %15 = arith.addf %12, %14 : vector<16x32xf32>
      %c0_14 = arith.constant 0 : index
      %c0_15 = arith.constant 0 : index
      %16 = vector.load %arg5[%c0_14, %c0_15] : memref<16x32xbf16, #tpu.memory_space<vmem>>, vector<16x32xbf16>
      %17 = arith.extf %16 : vector<16x32xbf16> to vector<16x32xf32>
      %18 = arith.addf %15, %17 : vector<16x32xf32>
      %c0_16 = arith.constant 0 : index
      %c0_17 = arith.constant 0 : index
      %19 = vector.load %arg6[%c0_16, %c0_17] : memref<1x32xf32, #tpu.memory_space<vmem>>, vector<1x32xf32>
      %c0_18 = arith.constant 0 : index
      %c0_19 = arith.constant 0 : index
      %20 = vector.load %arg7[%c0_18, %c0_19] : memref<1x32xf32, #tpu.memory_space<vmem>>, vector<1x32xf32>
      %cst_20 = arith.constant dense<0.000000e+00> : vector<16xf32>
      %21 = vector.multi_reduction <add>, %18, %cst_20 [1] : vector<16x32xf32> to vector<16xf32>
      %22 = vector.shape_cast %21 : vector<16xf32> to vector<16x1xf32>
      %cst_21 = arith.constant 3.200000e+01 : f32
      %23 = vector.broadcast %cst_21 : f32 to vector<16x1xf32>
      %24 = arith.divf %22, %23 : vector<16x1xf32>
      %25 = vector.broadcast %24 : vector<16x1xf32> to vector<16x32xf32>
      %26 = arith.subf %18, %25 : vector<16x32xf32>
      %27 = arith.mulf %26, %26 : vector<16x32xf32>
      %cst_22 = arith.constant dense<0.000000e+00> : vector<16xf32>
      %28 = vector.multi_reduction <add>, %27, %cst_22 [1] : vector<16x32xf32> to vector<16xf32>
      %29 = vector.shape_cast %28 : vector<16xf32> to vector<16x1xf32>
      %cst_23 = arith.constant 3.200000e+01 : f32
      %30 = vector.broadcast %cst_23 : f32 to vector<16x1xf32>
      %31 = arith.divf %29, %30 : vector<16x1xf32>
      %32 = vector.broadcast %24 : vector<16x1xf32> to vector<16x32xf32>
      %33 = arith.subf %18, %32 : vector<16x32xf32>
      %cst_24 = arith.constant 9.99999996E-13 : f32
      %34 = vector.broadcast %cst_24 : f32 to vector<16x1xf32>
      %35 = arith.addf %31, %34 : vector<16x1xf32>
      %36 = math.rsqrt %35 : vector<16x1xf32>
      %37 = vector.broadcast %36 : vector<16x1xf32> to vector<16x32xf32>
      %38 = arith.mulf %33, %37 : vector<16x32xf32>
      %39 = vector.broadcast %19 : vector<1x32xf32> to vector<16x32xf32>
      %40 = arith.mulf %38, %39 : vector<16x32xf32>
      %41 = vector.broadcast %20 : vector<1x32xf32> to vector<16x32xf32>
      %42 = arith.addf %40, %41 : vector<16x32xf32>
      %43 = arith.truncf %42 : vector<16x32xf32> to vector<16x32xbf16>
      %c0_25 = arith.constant 0 : index
      %c0_26 = arith.constant 0 : index
      %44 = vector.load %arg8[%c0_25, %c0_26] : memref<16x32xbf16, #tpu.memory_space<vmem>>, vector<16x32xbf16>
      tpu.vector_store %arg8[%c0_25, %c0_26], %43 {strides = array<i32>} : memref<16x32xbf16, #tpu.memory_space<vmem>>, vector<16x32xbf16>,
    } else {
    }
    return
  }
  func.func @transform_0(%arg0: i32, %arg1: i32) -> (i32, i32) {
    %c0_i32 = arith.constant 0 : i32
    return %arg0, %arg1 : i32, i32
  }
  func.func @transform_1(%arg0: i32, %arg1: i32) -> (i32, i32) {
    %c0_i32 = arith.constant 0 : i32
    %c0_i32_0 = arith.constant 0 : i32
    return %arg1, %c0_i32 : i32, i32
  }
  func.func @transform_2(%arg0: i32, %arg1: i32) -> (i32, i32) {
    %c0_i32 = arith.constant 0 : i32
    %c0_i32_0 = arith.constant 0 : i32
    %c0_i32_1 = arith.constant 0 : i32
    return %c0_i32, %c0_i32_0 : i32, i32
  }
  func.func @transform_3(%arg0: i32, %arg1: i32) -> (i32, i32) {
    %c0_i32 = arith.constant 0 : i32
    %c0_i32_0 = arith.constant 0 : i32
    return %arg0, %c0_i32 : i32, i32
  }
  func.func @transform_4(%arg0: i32, %arg1: i32) -> (i32, i32) {
    %c0_i32 = arith.constant 0 : i32
    %c0_i32_0 = arith.constant 0 : i32
    %c0_i32_1 = arith.constant 0 : i32
    return %c0_i32, %c0_i32_0 : i32, i32
  }
  func.func @transform_5(%arg0: i32, %arg1: i32) -> (i32, i32) {
    %c0_i32 = arith.constant 0 : i32
    %c0_i32_0 = arith.constant 0 : i32
    %c0_i32_1 = arith.constant 0 : i32
    return %c0_i32, %c0_i32_0 : i32, i32
  }
  func.func @transform_6(%arg0: i32, %arg1: i32) -> (i32, i32) {
    %c0_i32 = arith.constant 0 : i32
    %c0_i32_0 = arith.constant 0 : i32
    return %arg0, %c0_i32 : i32, i32
  }
}

module attributes {stable_mosaic.version = 11 : i64} {
  func.func @_attn_kernel(%arg0: i32, %arg1: i32, %arg2: i32, %arg3: memref<1x8x32xbf16, #tpu.memory_space<vmem>>, %arg4: memref<1x8x32xbf16, #tpu.memory_space<vmem>>, %arg5: memref<1x8x32xbf16, #tpu.memory_space<vmem>>, %arg6: memref<1x1x8xf32, #tpu.memory_space<vmem>>, %arg7: memref<8x32xbf16, #tpu.memory_space<vmem>>, %arg8: memref<8x2xf32, #tpu.memory_space<vmem>>, %arg9: memref<8x2xf32, #tpu.memory_space<vmem>>, %arg10: memref<8x32xf32, #tpu.memory_space<vmem>>) attributes {dimension_semantics = [#tpu.dimension_semantics<parallel>, #tpu.dimension_semantics<parallel>, #tpu.dimension_semantics<arbitrary>], iteration_bounds = array<i64: 2, 1, 1>, scalar_prefetch = 0 : i64, scratch_operands = 3 : i64, tpu.core_type = #tpu.core_type<tc>, window_params = [{transform_indices = @transform_0, window_bounds = array<i64: 1, 8, 32>}, {transform_indices = @transform_1, window_bounds = array<i64: 1, 8, 32>}, {transform_indices = @transform_2, window_bounds = array<i64: 1, 8, 32>}, {transform_indices = @transform_3, window_bounds = array<i64: 1, 1, 8>}, {transform_indices = @transform_4, window_bounds = array<i64: 8, 32>}]} {
    %c0_i32 = arith.constant 0 : i32
    %0 = arith.cmpi eq, %arg2, %c0_i32 : i32
    %1 = arith.extui %0 : i1 to i32
    %c0_i32_0 = arith.constant 0 : i32
    %2 = arith.cmpi ne, %1, %c0_i32_0 : i32
    scf.if %2 {
      %cst_43 = arith.constant 0xFF800000 : f32
      %72 = vector.broadcast %cst_43 : f32 to vector<8x2xf32>
      %c0_44 = arith.constant 0 : index
      %c0_45 = arith.constant 0 : index
      %73 = vector.load %arg8[%c0_44, %c0_45] : memref<8x2xf32, #tpu.memory_space<vmem>>, vector<8x2xf32>
      tpu.vector_store %arg8[%c0_44, %c0_45], %72 {strides = array<i32>} : memref<8x2xf32, #tpu.memory_space<vmem>>, vector<8x2xf32>,
      %cst_46 = arith.constant 0.000000e+00 : f32
      %74 = vector.broadcast %cst_46 : f32 to vector<8x2xf32>
      %c0_47 = arith.constant 0 : index
      %c0_48 = arith.constant 0 : index
      %75 = vector.load %arg9[%c0_47, %c0_48] : memref<8x2xf32, #tpu.memory_space<vmem>>, vector<8x2xf32>
      tpu.vector_store %arg9[%c0_47, %c0_48], %74 {strides = array<i32>} : memref<8x2xf32, #tpu.memory_space<vmem>>, vector<8x2xf32>,
      %cst_49 = arith.constant 0.000000e+00 : f32
      %76 = vector.broadcast %cst_49 : f32 to vector<8x32xf32>
      %c0_50 = arith.constant 0 : index
      %c0_51 = arith.constant 0 : index
      %77 = vector.load %arg10[%c0_50, %c0_51] : memref<8x32xf32, #tpu.memory_space<vmem>>, vector<8x32xf32>
      tpu.vector_store %arg10[%c0_50, %c0_51], %76 {strides = array<i32>} : memref<8x32xf32, #tpu.memory_space<vmem>>, vector<8x32xf32>,
    } else {
    }
    %c0 = arith.constant 0 : index
    %c0_1 = arith.constant 0 : index
    %c0_2 = arith.constant 0 : index
    %3 = vector.load %arg6[%c0, %c0_1, %c0_2] : memref<1x1x8xf32, #tpu.memory_space<vmem>>, vector<1x1x8xf32>
    %4 = vector.shape_cast %3 : vector<1x1x8xf32> to vector<1x8xf32>
    %c0_3 = arith.constant 0 : index
    %c0_4 = arith.constant 0 : index
    %c0_5 = arith.constant 0 : index
    %5 = vector.load %arg3[%c0_3, %c0_4, %c0_5] : memref<1x8x32xbf16, #tpu.memory_space<vmem>>, vector<1x8x32xbf16>
    %6 = vector.shape_cast %5 : vector<1x8x32xbf16> to vector<8x32xbf16>
    %c0_6 = arith.constant 0 : index
    %c0_7 = arith.constant 0 : index
    %c0_8 = arith.constant 0 : index
    %7 = vector.load %arg4[%c0_6, %c0_7, %c0_8] : memref<1x8x32xbf16, #tpu.memory_space<vmem>>, vector<1x8x32xbf16>
    %8 = vector.shape_cast %7 : vector<1x8x32xbf16> to vector<8x32xbf16>
    %c0_9 = arith.constant 0 : index
    %c0_10 = arith.constant 0 : index
    %c0_11 = arith.constant 0 : index
    %9 = vector.load %arg5[%c0_9, %c0_10, %c0_11] : memref<1x8x32xbf16, #tpu.memory_space<vmem>>, vector<1x8x32xbf16>
    %10 = vector.shape_cast %9 : vector<1x8x32xbf16> to vector<8x32xbf16>
    %11 = vector.extract_strided_slice %6 {offsets = [0, 0], sizes = [8, 16], strides = [1, 1]} : vector<8x32xbf16> to vector<8x16xbf16>
    %12 = vector.extract_strided_slice %8 {offsets = [0, 0], sizes = [8, 16], strides = [1, 1]} : vector<8x32xbf16> to vector<8x16xbf16>
    "tpu.trace_start"() <{level = 10 : i32, message = "qd,kd->qk"}> : () -> ()
    %cst = arith.constant dense<0.000000e+00> : vector<8x8xf32>
    %13 = tpu.matmul %11, %12, %cst {dimension_numbers = #tpu.dot_dimension_numbers<[1], [1], [0], [0], [0, 0, 1, 0], [], []>} : vector<8x16xbf16>, vector<8x16xbf16>, vector<8x8xf32> -> vector<8x8xf32>
    "tpu.trace_stop"() : () -> ()
    %14 = vector.broadcast %4 : vector<1x8xf32> to vector<8x8xf32>
    %15 = arith.addf %13, %14 : vector<8x8xf32>
    %c0_12 = arith.constant 0 : index
    %c0_13 = arith.constant 0 : index
    %16 = vector.load %arg8[%c0_12, %c0_13] : memref<8x2xf32, #tpu.memory_space<vmem>>, vector<8x1xf32>
    %cst_14 = arith.constant dense<0xFF800000> : vector<8xf32>
    %17 = vector.multi_reduction <maximumf>, %15, %cst_14 [1] : vector<8x8xf32> to vector<8xf32>
    %18 = vector.shape_cast %17 : vector<8xf32> to vector<8x1xf32>
    %19 = arith.maximumf %16, %18 : vector<8x1xf32>
    %20 = arith.subf %16, %19 : vector<8x1xf32>
    %21 = math.exp %20 : vector<8x1xf32>
    %22 = vector.broadcast %19 : vector<8x1xf32> to vector<8x8xf32>
    %23 = arith.subf %15, %22 : vector<8x8xf32>
    %24 = math.exp %23 : vector<8x8xf32>
    %c0_15 = arith.constant 0 : index
    %c0_16 = arith.constant 0 : index
    %25 = vector.load %arg9[%c0_15, %c0_16] : memref<8x2xf32, #tpu.memory_space<vmem>>, vector<8x1xf32>
    %26 = arith.mulf %21, %25 : vector<8x1xf32>
    %cst_17 = arith.constant dense<0.000000e+00> : vector<8xf32>
    %27 = vector.multi_reduction <add>, %24, %cst_17 [1] : vector<8x8xf32> to vector<8xf32>
    %28 = vector.shape_cast %27 : vector<8xf32> to vector<8x1xf32>
    %29 = arith.addf %26, %28 : vector<8x1xf32>
    %c0_18 = arith.constant 0 : index
    %c0_19 = arith.constant 0 : index
    %30 = vector.load %arg9[%c0_18, %c0_19] : memref<8x2xf32, #tpu.memory_space<vmem>>, vector<8x1xf32>
    tpu.vector_store %arg9[%c0_18, %c0_19], %29 {strides = array<i32>} : memref<8x2xf32, #tpu.memory_space<vmem>>, vector<8x1xf32>,
    %c0_20 = arith.constant 0 : index
    %c0_21 = arith.constant 0 : index
    %31 = vector.load %arg10[%c0_20, %c0_21] : memref<8x32xf32, #tpu.memory_space<vmem>>, vector<8x16xf32>
    %32 = vector.broadcast %21 : vector<8x1xf32> to vector<8x16xf32>
    %33 = arith.mulf %32, %31 : vector<8x16xf32>
    %34 = arith.truncf %24 : vector<8x8xf32> to vector<8x8xbf16>
    %35 = vector.extract_strided_slice %10 {offsets = [0, 0], sizes = [8, 16], strides = [1, 1]} : vector<8x32xbf16> to vector<8x16xbf16>
    %cst_22 = arith.constant dense<0.000000e+00> : vector<8x16xf32>
    %36 = tpu.matmul %34, %35, %cst_22 {dimension_numbers = #tpu.dot_dimension_numbers<[1], [0], [0], [1], [0, 0, 1, 1], [], []>} : vector<8x8xbf16>, vector<8x16xbf16>, vector<8x16xf32> -> vector<8x16xf32>
    %37 = arith.addf %33, %36 : vector<8x16xf32>
    %c0_23 = arith.constant 0 : index
    %c0_24 = arith.constant 0 : index
    %38 = vector.load %arg10[%c0_23, %c0_24] : memref<8x32xf32, #tpu.memory_space<vmem>>, vector<8x16xf32>
    tpu.vector_store %arg10[%c0_23, %c0_24], %37 {strides = array<i32>} : memref<8x32xf32, #tpu.memory_space<vmem>>, vector<8x16xf32>,
    %c0_25 = arith.constant 0 : index
    %c0_26 = arith.constant 0 : index
    %39 = vector.load %arg8[%c0_25, %c0_26] : memref<8x2xf32, #tpu.memory_space<vmem>>, vector<8x1xf32>
    tpu.vector_store %arg8[%c0_25, %c0_26], %19 {strides = array<i32>} : memref<8x2xf32, #tpu.memory_space<vmem>>, vector<8x1xf32>,
    %40 = vector.extract_strided_slice %6 {offsets = [0, 16], sizes = [8, 16], strides = [1, 1]} : vector<8x32xbf16> to vector<8x16xbf16>
    %41 = vector.extract_strided_slice %8 {offsets = [0, 16], sizes = [8, 16], strides = [1, 1]} : vector<8x32xbf16> to vector<8x16xbf16>
    "tpu.trace_start"() <{level = 10 : i32, message = "qd,kd->qk"}> : () -> ()
    %cst_27 = arith.constant dense<0.000000e+00> : vector<8x8xf32>
    %42 = tpu.matmul %40, %41, %cst_27 {dimension_numbers = #tpu.dot_dimension_numbers<[1], [1], [0], [0], [0, 0, 1, 0], [], []>} : vector<8x16xbf16>, vector<8x16xbf16>, vector<8x8xf32> -> vector<8x8xf32>
    "tpu.trace_stop"() : () -> ()
    %43 = vector.broadcast %4 : vector<1x8xf32> to vector<8x8xf32>
    %44 = arith.addf %42, %43 : vector<8x8xf32>
    %c0_28 = arith.constant 0 : index
    %c1 = arith.constant 1 : index
    %45 = vector.load %arg8[%c0_28, %c1] : memref<8x2xf32, #tpu.memory_space<vmem>>, vector<8x1xf32>
    %cst_29 = arith.constant dense<0xFF800000> : vector<8xf32>
    %46 = vector.multi_reduction <maximumf>, %44, %cst_29 [1] : vector<8x8xf32> to vector<8xf32>
    %47 = vector.shape_cast %46 : vector<8xf32> to vector<8x1xf32>
    %48 = arith.maximumf %45, %47 : vector<8x1xf32>
    %49 = arith.subf %45, %48 : vector<8x1xf32>
    %50 = math.exp %49 : vector<8x1xf32>
    %51 = vector.broadcast %48 : vector<8x1xf32> to vector<8x8xf32>
    %52 = arith.subf %44, %51 : vector<8x8xf32>
    %53 = math.exp %52 : vector<8x8xf32>
    %c0_30 = arith.constant 0 : index
    %c1_31 = arith.constant 1 : index
    %54 = vector.load %arg9[%c0_30, %c1_31] : memref<8x2xf32, #tpu.memory_space<vmem>>, vector<8x1xf32>
    %55 = arith.mulf %50, %54 : vector<8x1xf32>
    %cst_32 = arith.constant dense<0.000000e+00> : vector<8xf32>
    %56 = vector.multi_reduction <add>, %53, %cst_32 [1] : vector<8x8xf32> to vector<8xf32>
    %57 = vector.shape_cast %56 : vector<8xf32> to vector<8x1xf32>
    %58 = arith.addf %55, %57 : vector<8x1xf32>
    %c0_33 = arith.constant 0 : index
    %c1_34 = arith.constant 1 : index
    %59 = vector.load %arg9[%c0_33, %c1_34] : memref<8x2xf32, #tpu.memory_space<vmem>>, vector<8x1xf32>
    tpu.vector_store %arg9[%c0_33, %c1_34], %58 {strides = array<i32>} : memref<8x2xf32, #tpu.memory_space<vmem>>, vector<8x1xf32>,
    %c0_35 = arith.constant 0 : index
    %c16 = arith.constant 16 : index
    %60 = vector.load %arg10[%c0_35, %c16] : memref<8x32xf32, #tpu.memory_space<vmem>>, vector<8x16xf32>
    %61 = vector.broadcast %50 : vector<8x1xf32> to vector<8x16xf32>
    %62 = arith.mulf %61, %60 : vector<8x16xf32>
    %63 = arith.truncf %53 : vector<8x8xf32> to vector<8x8xbf16>
    %64 = vector.extract_strided_slice %10 {offsets = [0, 16], sizes = [8, 16], strides = [1, 1]} : vector<8x32xbf16> to vector<8x16xbf16>
    %cst_36 = arith.constant dense<0.000000e+00> : vector<8x16xf32>
    %65 = tpu.matmul %63, %64, %cst_36 {dimension_numbers = #tpu.dot_dimension_numbers<[1], [0], [0], [1], [0, 0, 1, 1], [], []>} : vector<8x8xbf16>, vector<8x16xbf16>, vector<8x16xf32> -> vector<8x16xf32>
    %66 = arith.addf %62, %65 : vector<8x16xf32>
    %c0_37 = arith.constant 0 : index
    %c16_38 = arith.constant 16 : index
    %67 = vector.load %arg10[%c0_37, %c16_38] : memref<8x32xf32, #tpu.memory_space<vmem>>, vector<8x16xf32>
    tpu.vector_store %arg10[%c0_37, %c16_38], %66 {strides = array<i32>} : memref<8x32xf32, #tpu.memory_space<vmem>>, vector<8x16xf32>,
    %c0_39 = arith.constant 0 : index
    %c1_40 = arith.constant 1 : index
    %68 = vector.load %arg8[%c0_39, %c1_40] : memref<8x2xf32, #tpu.memory_space<vmem>>, vector<8x1xf32>
    tpu.vector_store %arg8[%c0_39, %c1_40], %48 {strides = array<i32>} : memref<8x2xf32, #tpu.memory_space<vmem>>, vector<8x1xf32>,
    %c0_i32_41 = arith.constant 0 : i32
    %69 = arith.cmpi eq, %arg2, %c0_i32_41 : i32
    %70 = arith.extui %69 : i1 to i32
    %c0_i32_42 = arith.constant 0 : i32
    %71 = arith.cmpi ne, %70, %c0_i32_42 : i32
    scf.if %71 {
      %c0_43 = arith.constant 0 : index
      %c0_44 = arith.constant 0 : index
      %72 = vector.load %arg9[%c0_43, %c0_44] : memref<8x2xf32, #tpu.memory_space<vmem>>, vector<8x1xf32>
      %73 = tpu.reciprocal %72 : vector<8x1xf32> -> vector<8x1xf32>
      %c0_45 = arith.constant 0 : index
      %c0_46 = arith.constant 0 : index
      %74 = vector.load %arg10[%c0_45, %c0_46] : memref<8x32xf32, #tpu.memory_space<vmem>>, vector<8x16xf32>
      %75 = vector.broadcast %73 : vector<8x1xf32> to vector<8x16xf32>
      %76 = arith.mulf %74, %75 : vector<8x16xf32>
      %77 = arith.truncf %76 : vector<8x16xf32> to vector<8x16xbf16>
      %c0_47 = arith.constant 0 : index
      %c0_48 = arith.constant 0 : index
      %78 = vector.load %arg7[%c0_47, %c0_48] : memref<8x32xbf16, #tpu.memory_space<vmem>>, vector<8x16xbf16>
      tpu.vector_store %arg7[%c0_47, %c0_48], %77 {strides = array<i32>} : memref<8x32xbf16, #tpu.memory_space<vmem>>, vector<8x16xbf16>,
      %c0_49 = arith.constant 0 : index
      %c1_50 = arith.constant 1 : index
      %79 = vector.load %arg9[%c0_49, %c1_50] : memref<8x2xf32, #tpu.memory_space<vmem>>, vector<8x1xf32>
      %80 = tpu.reciprocal %79 : vector<8x1xf32> -> vector<8x1xf32>
      %c0_51 = arith.constant 0 : index
      %c16_52 = arith.constant 16 : index
      %81 = vector.load %arg10[%c0_51, %c16_52] : memref<8x32xf32, #tpu.memory_space<vmem>>, vector<8x16xf32>
      %82 = vector.broadcast %80 : vector<8x1xf32> to vector<8x16xf32>
      %83 = arith.mulf %81, %82 : vector<8x16xf32>
      %84 = arith.truncf %83 : vector<8x16xf32> to vector<8x16xbf16>
      %c0_53 = arith.constant 0 : index
      %c16_54 = arith.constant 16 : index
      %85 = vector.load %arg7[%c0_53, %c16_54] : memref<8x32xbf16, #tpu.memory_space<vmem>>, vector<8x16xbf16>
      tpu.vector_store %arg7[%c0_53, %c16_54], %84 {strides = array<i32>} : memref<8x32xbf16, #tpu.memory_space<vmem>>, vector<8x16xbf16>,
    } else {
    }
    return
  }
  func.func @transform_0(%arg0: i32, %arg1: i32, %arg2: i32) -> (i32, i32, i32) {
    %c1_i32 = arith.constant 1 : i32
    %0 = arith.muli %arg0, %c1_i32 : i32
    %1 = arith.addi %0, %arg1 : i32
    %c0_i32 = arith.constant 0 : i32
    %c0_i32_0 = arith.constant 0 : i32
    %c0_i32_1 = arith.constant 0 : i32
    return %c0_i32, %1, %c0_i32_0 : i32, i32, i32
  }
  func.func @transform_1(%arg0: i32, %arg1: i32, %arg2: i32) -> (i32, i32, i32) {
    %c1_i32 = arith.constant 1 : i32
    %0 = arith.muli %arg0, %c1_i32 : i32
    %1 = arith.addi %0, %arg2 : i32
    %c1_i32_0 = arith.constant 1 : i32
    %c0_i32 = arith.constant 0 : i32
    %c0_i32_1 = arith.constant 0 : i32
    return %c1_i32_0, %1, %c0_i32 : i32, i32, i32
  }
  func.func @transform_2(%arg0: i32, %arg1: i32, %arg2: i32) -> (i32, i32, i32) {
    %c1_i32 = arith.constant 1 : i32
    %0 = arith.muli %arg0, %c1_i32 : i32
    %1 = arith.addi %0, %arg2 : i32
    %c2_i32 = arith.constant 2 : i32
    %c0_i32 = arith.constant 0 : i32
    %c0_i32_0 = arith.constant 0 : i32
    return %c2_i32, %1, %c0_i32 : i32, i32, i32
  }
  func.func @transform_3(%arg0: i32, %arg1: i32, %arg2: i32) -> (i32, i32, i32) {
    %c0_i32 = arith.constant 0 : i32
    %c0_i32_0 = arith.constant 0 : i32
    return %arg0, %c0_i32, %arg2 : i32, i32, i32
  }
  func.func @transform_4(%arg0: i32, %arg1: i32, %arg2: i32) -> (i32, i32) {
    %c1_i32 = arith.constant 1 : i32
    %0 = arith.muli %arg0, %c1_i32 : i32
    %1 = arith.addi %0, %arg1 : i32
    %c0_i32 = arith.constant 0 : i32
    %c0_i32_0 = arith.constant 0 : i32
    return %1, %c0_i32 : i32, i32
  }
}

module attributes {stable_mosaic.version = 11 : i64} {
  func.func @_linear_kernel(%arg0: i32, %arg1: i32, %arg2: i32, %arg3: memref<16x32xbf16, #tpu.memory_space<vmem>>, %arg4: memref<32x64xbf16, #tpu.memory_space<vmem>>, %arg5: memref<1x64xf32, #tpu.memory_space<vmem>>, %arg6: memref<16x64xbf16, #tpu.memory_space<vmem>>, %arg7: memref<16x64xf32, #tpu.memory_space<vmem>>) attributes {dimension_semantics = [#tpu.dimension_semantics<parallel>, #tpu.dimension_semantics<parallel>, #tpu.dimension_semantics<arbitrary>], iteration_bounds = array<i64: 1, 1, 1>, scalar_prefetch = 0 : i64, scratch_operands = 1 : i64, tpu.core_type = #tpu.core_type<tc>, window_params = [{transform_indices = @transform_0, window_bounds = array<i64: 16, 32>}, {transform_indices = @transform_1, window_bounds = array<i64: 32, 64>}, {transform_indices = @transform_2, window_bounds = array<i64: 1, 64>}, {transform_indices = @transform_3, window_bounds = array<i64: 16, 64>}]} {
    %c0_i32 = arith.constant 0 : i32
    %0 = arith.cmpi eq, %arg2, %c0_i32 : i32
    %1 = arith.extui %0 : i1 to i32
    %c0_i32_0 = arith.constant 0 : i32
    %2 = arith.cmpi ne, %1, %c0_i32_0 : i32
    scf.if %2 {
      %cst_10 = arith.constant 0.000000e+00 : f32
      %12 = vector.broadcast %cst_10 : f32 to vector<16x64xf32>
      %c0_11 = arith.constant 0 : index
      %c0_12 = arith.constant 0 : index
      %13 = vector.load %arg7[%c0_11, %c0_12] : memref<16x64xf32, #tpu.memory_space<vmem>>, vector<16x64xf32>
      tpu.vector_store %arg7[%c0_11, %c0_12], %12 {strides = array<i32>} : memref<16x64xf32, #tpu.memory_space<vmem>>, vector<16x64xf32>,
    } else {
    }
    %c0 = arith.constant 0 : index
    %c0_1 = arith.constant 0 : index
    %3 = vector.load %arg7[%c0, %c0_1] : memref<16x64xf32, #tpu.memory_space<vmem>>, vector<16x64xf32>
    %c0_2 = arith.constant 0 : index
    %c0_3 = arith.constant 0 : index
    %4 = vector.load %arg3[%c0_2, %c0_3] : memref<16x32xbf16, #tpu.memory_space<vmem>>, vector<16x32xbf16>
    %c0_4 = arith.constant 0 : index
    %c0_5 = arith.constant 0 : index
    %5 = vector.load %arg4[%c0_4, %c0_5] : memref<32x64xbf16, #tpu.memory_space<vmem>>, vector<32x64xbf16>
    %cst = arith.constant dense<0.000000e+00> : vector<16x64xf32>
    %6 = tpu.matmul %4, %5, %cst {dimension_numbers = #tpu.dot_dimension_numbers<[1], [0], [0], [1], [0, 0, 1, 1], [], []>} : vector<16x32xbf16>, vector<32x64xbf16>, vector<16x64xf32> -> vector<16x64xf32>
    %7 = arith.addf %3, %6 : vector<16x64xf32>
    %c0_6 = arith.constant 0 : index
    %c0_7 = arith.constant 0 : index
    %8 = vector.load %arg7[%c0_6, %c0_7] : memref<16x64xf32, #tpu.memory_space<vmem>>, vector<16x64xf32>
    tpu.vector_store %arg7[%c0_6, %c0_7], %7 {strides = array<i32>} : memref<16x64xf32, #tpu.memory_space<vmem>>, vector<16x64xf32>,
    %c0_i32_8 = arith.constant 0 : i32
    %9 = arith.cmpi eq, %arg2, %c0_i32_8 : i32
    %10 = arith.extui %9 : i1 to i32
    %c0_i32_9 = arith.constant 0 : i32
    %11 = arith.cmpi ne, %10, %c0_i32_9 : i32
    scf.if %11 {
      %c0_10 = arith.constant 0 : index
      %c0_11 = arith.constant 0 : index
      %12 = vector.load %arg7[%c0_10, %c0_11] : memref<16x64xf32, #tpu.memory_space<vmem>>, vector<16x64xf32>
      %c0_12 = arith.constant 0 : index
      %c0_13 = arith.constant 0 : index
      %13 = vector.load %arg5[%c0_12, %c0_13] : memref<1x64xf32, #tpu.memory_space<vmem>>, vector<1x64xf32>
      %14 = vector.broadcast %13 : vector<1x64xf32> to vector<16x64xf32>
      %15 = arith.addf %12, %14 : vector<16x64xf32>
      %cst_14 = arith.constant 5.000000e-01 : f32
      %16 = vector.broadcast %cst_14 : f32 to vector<16x64xf32>
      %17 = arith.mulf %16, %15 : vector<16x64xf32>
      %cst_15 = arith.constant 0.707106769 : f32
      %18 = vector.broadcast %cst_15 : f32 to vector<16x64xf32>
      %19 = arith.mulf %15, %18 : vector<16x64xf32>
      %20 = math.erf %19 : vector<16x64xf32>
      %cst_16 = arith.constant 1.000000e+00 : f32
      %21 = vector.broadcast %cst_16 : f32 to vector<16x64xf32>
      %22 = arith.addf %21, %20 : vector<16x64xf32>
      %23 = arith.mulf %17, %22 : vector<16x64xf32>
      %24 = arith.truncf %23 : vector<16x64xf32> to vector<16x64xbf16>
      %c0_17 = arith.constant 0 : index
      %c0_18 = arith.constant 0 : index
      %25 = vector.load %arg6[%c0_17, %c0_18] : memref<16x64xbf16, #tpu.memory_space<vmem>>, vector<16x64xbf16>
      tpu.vector_store %arg6[%c0_17, %c0_18], %24 {strides = array<i32>} : memref<16x64xbf16, #tpu.memory_space<vmem>>, vector<16x64xbf16>,
    } else {
    }
    return
  }
  func.func @transform_0(%arg0: i32, %arg1: i32, %arg2: i32) -> (i32, i32) {
    %c0_i32 = arith.constant 0 : i32
    return %arg0, %arg2 : i32, i32
  }
  func.func @transform_1(%arg0: i32, %arg1: i32, %arg2: i32) -> (i32, i32) {
    %c0_i32 = arith.constant 0 : i32
    return %arg2, %arg1 : i32, i32
  }
  func.func @transform_2(%arg0: i32, %arg1: i32, %arg2: i32) -> (i32, i32) {
    %c0_i32 = arith.constant 0 : i32
    %c0_i32_0 = arith.constant 0 : i32
    return %c0_i32, %arg1 : i32, i32
  }
  func.func @transform_3(%arg0: i32, %arg1: i32, %arg2: i32) -> (i32, i32) {
    %c0_i32 = arith.constant 0 : i32
    return %arg0, %arg1 : i32, i32
  }
}

module attributes {stable_mosaic.version = 11 : i64} {
  func.func @_linear_kernel(%arg0: i32, %arg1: i32, %arg2: i32, %arg3: memref<16x32xbf16, #tpu.memory_space<vmem>>, %arg4: memref<32x128xbf16, #tpu.memory_space<vmem>>, %arg5: memref<1x128xf32, #tpu.memory_space<vmem>>, %arg6: memref<16x128xf32, #tpu.memory_space<vmem>>, %arg7: memref<16x128xf32, #tpu.memory_space<vmem>>) attributes {dimension_semantics = [#tpu.dimension_semantics<parallel>, #tpu.dimension_semantics<parallel>, #tpu.dimension_semantics<arbitrary>], iteration_bounds = array<i64: 1, 1, 1>, scalar_prefetch = 0 : i64, scratch_operands = 1 : i64, tpu.core_type = #tpu.core_type<tc>, window_params = [{transform_indices = @transform_0, window_bounds = array<i64: 16, 32>}, {transform_indices = @transform_1, window_bounds = array<i64: 32, 128>}, {transform_indices = @transform_2, window_bounds = array<i64: 1, 128>}, {transform_indices = @transform_3, window_bounds = array<i64: 16, 128>}]} {
    %c0_i32 = arith.constant 0 : i32
    %0 = arith.cmpi eq, %arg2, %c0_i32 : i32
    %1 = arith.extui %0 : i1 to i32
    %c0_i32_0 = arith.constant 0 : i32
    %2 = arith.cmpi ne, %1, %c0_i32_0 : i32
    scf.if %2 {
      %cst_10 = arith.constant 0.000000e+00 : f32
      %12 = vector.broadcast %cst_10 : f32 to vector<16x128xf32>
      %c0_11 = arith.constant 0 : index
      %c0_12 = arith.constant 0 : index
      %13 = vector.load %arg7[%c0_11, %c0_12] : memref<16x128xf32, #tpu.memory_space<vmem>>, vector<16x128xf32>
      tpu.vector_store %arg7[%c0_11, %c0_12], %12 {strides = array<i32>} : memref<16x128xf32, #tpu.memory_space<vmem>>, vector<16x128xf32>,
    } else {
    }
    %c0 = arith.constant 0 : index
    %c0_1 = arith.constant 0 : index
    %3 = vector.load %arg7[%c0, %c0_1] : memref<16x128xf32, #tpu.memory_space<vmem>>, vector<16x128xf32>
    %c0_2 = arith.constant 0 : index
    %c0_3 = arith.constant 0 : index
    %4 = vector.load %arg3[%c0_2, %c0_3] : memref<16x32xbf16, #tpu.memory_space<vmem>>, vector<16x32xbf16>
    %c0_4 = arith.constant 0 : index
    %c0_5 = arith.constant 0 : index
    %5 = vector.load %arg4[%c0_4, %c0_5] : memref<32x128xbf16, #tpu.memory_space<vmem>>, vector<32x128xbf16>
    %cst = arith.constant dense<0.000000e+00> : vector<16x128xf32>
    %6 = tpu.matmul %4, %5, %cst {dimension_numbers = #tpu.dot_dimension_numbers<[1], [0], [0], [1], [0, 0, 1, 1], [], []>} : vector<16x32xbf16>, vector<32x128xbf16>, vector<16x128xf32> -> vector<16x128xf32>
    %7 = arith.addf %3, %6 : vector<16x128xf32>
    %c0_6 = arith.constant 0 : index
    %c0_7 = arith.constant 0 : index
    %8 = vector.load %arg7[%c0_6, %c0_7] : memref<16x128xf32, #tpu.memory_space<vmem>>, vector<16x128xf32>
    tpu.vector_store %arg7[%c0_6, %c0_7], %7 {strides = array<i32>} : memref<16x128xf32, #tpu.memory_space<vmem>>, vector<16x128xf32>,
    %c0_i32_8 = arith.constant 0 : i32
    %9 = arith.cmpi eq, %arg2, %c0_i32_8 : i32
    %10 = arith.extui %9 : i1 to i32
    %c0_i32_9 = arith.constant 0 : i32
    %11 = arith.cmpi ne, %10, %c0_i32_9 : i32
    scf.if %11 {
      %c0_10 = arith.constant 0 : index
      %c0_11 = arith.constant 0 : index
      %12 = vector.load %arg7[%c0_10, %c0_11] : memref<16x128xf32, #tpu.memory_space<vmem>>, vector<16x128xf32>
      %c0_12 = arith.constant 0 : index
      %c0_13 = arith.constant 0 : index
      %13 = vector.load %arg5[%c0_12, %c0_13] : memref<1x128xf32, #tpu.memory_space<vmem>>, vector<1x128xf32>
      %14 = vector.broadcast %13 : vector<1x128xf32> to vector<16x128xf32>
      %15 = arith.addf %12, %14 : vector<16x128xf32>
      %c0_14 = arith.constant 0 : index
      %c0_15 = arith.constant 0 : index
      %16 = vector.load %arg6[%c0_14, %c0_15] : memref<16x128xf32, #tpu.memory_space<vmem>>, vector<16x128xf32>
      tpu.vector_store %arg6[%c0_14, %c0_15], %15 {strides = array<i32>} : memref<16x128xf32, #tpu.memory_space<vmem>>, vector<16x128xf32>,
    } else {
    }
    return
  }
  func.func @transform_0(%arg0: i32, %arg1: i32, %arg2: i32) -> (i32, i32) {
    %c0_i32 = arith.constant 0 : i32
    return %arg0, %arg2 : i32, i32
  }
  func.func @transform_1(%arg0: i32, %arg1: i32, %arg2: i32) -> (i32, i32) {
    %c0_i32 = arith.constant 0 : i32
    return %arg2, %arg1 : i32, i32
  }
  func.func @transform_2(%arg0: i32, %arg1: i32, %arg2: i32) -> (i32, i32) {
    %c0_i32 = arith.constant 0 : i32
    %c0_i32_0 = arith.constant 0 : i32
    return %c0_i32, %arg1 : i32, i32
  }
  func.func @transform_3(%arg0: i32, %arg1: i32, %arg2: i32) -> (i32, i32) {
    %c0_i32 = arith.constant 0 : i32
    return %arg0, %arg1 : i32, i32
  }
}

module attributes {stable_mosaic.version = 11 : i64} {
  func.func @_linear_add_ln_kernel(%arg0: i32, %arg1: i32, %arg2: memref<16x64xbf16, #tpu.memory_space<vmem>>, %arg3: memref<64x32xbf16, #tpu.memory_space<vmem>>, %arg4: memref<1x32xf32, #tpu.memory_space<vmem>>, %arg5: memref<16x32xbf16, #tpu.memory_space<vmem>>, %arg6: memref<1x32xf32, #tpu.memory_space<vmem>>, %arg7: memref<1x32xf32, #tpu.memory_space<vmem>>, %arg8: memref<16x32xbf16, #tpu.memory_space<vmem>>, %arg9: memref<16x32xf32, #tpu.memory_space<vmem>>) attributes {dimension_semantics = [#tpu.dimension_semantics<parallel>, #tpu.dimension_semantics<arbitrary>], iteration_bounds = array<i64: 1, 1>, scalar_prefetch = 0 : i64, scratch_operands = 1 : i64, tpu.core_type = #tpu.core_type<tc>, window_params = [{transform_indices = @transform_0, window_bounds = array<i64: 16, 64>}, {transform_indices = @transform_1, window_bounds = array<i64: 64, 32>}, {pipeline_mode = #tpu.pipeline_mode<synchronous>, transform_indices = @transform_2, window_bounds = array<i64: 1, 32>}, {transform_indices = @transform_3, window_bounds = array<i64: 16, 32>}, {pipeline_mode = #tpu.pipeline_mode<synchronous>, transform_indices = @transform_4, window_bounds = array<i64: 1, 32>}, {pipeline_mode = #tpu.pipeline_mode<synchronous>, transform_indices = @transform_5, window_bounds = array<i64: 1, 32>}, {transform_indices = @transform_6, window_bounds = array<i64: 16, 32>}]} {
    %c0_i32 = arith.constant 0 : i32
    %0 = arith.cmpi eq, %arg1, %c0_i32 : i32
    %1 = arith.extui %0 : i1 to i32
    %c0_i32_0 = arith.constant 0 : i32
    %2 = arith.cmpi ne, %1, %c0_i32_0 : i32
    scf.if %2 {
      %cst_10 = arith.constant 0.000000e+00 : f32
      %12 = vector.broadcast %cst_10 : f32 to vector<16x32xf32>
      %c0_11 = arith.constant 0 : index
      %c0_12 = arith.constant 0 : index
      %13 = vector.load %arg9[%c0_11, %c0_12] : memref<16x32xf32, #tpu.memory_space<vmem>>, vector<16x32xf32>
      tpu.vector_store %arg9[%c0_11, %c0_12], %12 {strides = array<i32>} : memref<16x32xf32, #tpu.memory_space<vmem>>, vector<16x32xf32>,
    } else {
    }
    %c0 = arith.constant 0 : index
    %c0_1 = arith.constant 0 : index
    %3 = vector.load %arg9[%c0, %c0_1] : memref<16x32xf32, #tpu.memory_space<vmem>>, vector<16x32xf32>
    %c0_2 = arith.constant 0 : index
    %c0_3 = arith.constant 0 : index
    %4 = vector.load %arg2[%c0_2, %c0_3] : memref<16x64xbf16, #tpu.memory_space<vmem>>, vector<16x64xbf16>
    %c0_4 = arith.constant 0 : index
    %c0_5 = arith.constant 0 : index
    %5 = vector.load %arg3[%c0_4, %c0_5] : memref<64x32xbf16, #tpu.memory_space<vmem>>, vector<64x32xbf16>
    %cst = arith.constant dense<0.000000e+00> : vector<16x32xf32>
    %6 = tpu.matmul %4, %5, %cst {dimension_numbers = #tpu.dot_dimension_numbers<[1], [0], [0], [1], [0, 0, 1, 1], [], []>} : vector<16x64xbf16>, vector<64x32xbf16>, vector<16x32xf32> -> vector<16x32xf32>
    %7 = arith.addf %3, %6 : vector<16x32xf32>
    %c0_6 = arith.constant 0 : index
    %c0_7 = arith.constant 0 : index
    %8 = vector.load %arg9[%c0_6, %c0_7] : memref<16x32xf32, #tpu.memory_space<vmem>>, vector<16x32xf32>
    tpu.vector_store %arg9[%c0_6, %c0_7], %7 {strides = array<i32>} : memref<16x32xf32, #tpu.memory_space<vmem>>, vector<16x32xf32>,
    %c0_i32_8 = arith.constant 0 : i32
    %9 = arith.cmpi eq, %arg1, %c0_i32_8 : i32
    %10 = arith.extui %9 : i1 to i32
    %c0_i32_9 = arith.constant 0 : i32
    %11 = arith.cmpi ne, %10, %c0_i32_9 : i32
    scf.if %11 {
      %c0_10 = arith.constant 0 : index
      %c0_11 = arith.constant 0 : index
      %12 = vector.load %arg9[%c0_10, %c0_11] : memref<16x32xf32, #tpu.memory_space<vmem>>, vector<16x32xf32>
      %c0_12 = arith.constant 0 : index
      %c0_13 = arith.constant 0 : index
      %13 = vector.load %arg4[%c0_12, %c0_13] : memref<1x32xf32, #tpu.memory_space<vmem>>, vector<1x32xf32>
      %14 = vector.broadcast %13 : vector<1x32xf32> to vector<16x32xf32>
      %15 = arith.addf %12, %14 : vector<16x32xf32>
      %c0_14 = arith.constant 0 : index
      %c0_15 = arith.constant 0 : index
      %16 = vector.load %arg5[%c0_14, %c0_15] : memref<16x32xbf16, #tpu.memory_space<vmem>>, vector<16x32xbf16>
      %17 = arith.extf %16 : vector<16x32xbf16> to vector<16x32xf32>
      %18 = arith.addf %15, %17 : vector<16x32xf32>
      %c0_16 = arith.constant 0 : index
      %c0_17 = arith.constant 0 : index
      %19 = vector.load %arg6[%c0_16, %c0_17] : memref<1x32xf32, #tpu.memory_space<vmem>>, vector<1x32xf32>
      %c0_18 = arith.constant 0 : index
      %c0_19 = arith.constant 0 : index
      %20 = vector.load %arg7[%c0_18, %c0_19] : memref<1x32xf32, #tpu.memory_space<vmem>>, vector<1x32xf32>
      %cst_20 = arith.constant dense<0.000000e+00> : vector<16xf32>
      %21 = vector.multi_reduction <add>, %18, %cst_20 [1] : vector<16x32xf32> to vector<16xf32>
      %22 = vector.shape_cast %21 : vector<16xf32> to vector<16x1xf32>
      %cst_21 = arith.constant 3.200000e+01 : f32
      %23 = vector.broadcast %cst_21 : f32 to vector<16x1xf32>
      %24 = arith.divf %22, %23 : vector<16x1xf32>
      %25 = vector.broadcast %24 : vector<16x1xf32> to vector<16x32xf32>
      %26 = arith.subf %18, %25 : vector<16x32xf32>
      %27 = arith.mulf %26, %26 : vector<16x32xf32>
      %cst_22 = arith.constant dense<0.000000e+00> : vector<16xf32>
      %28 = vector.multi_reduction <add>, %27, %cst_22 [1] : vector<16x32xf32> to vector<16xf32>
      %29 = vector.shape_cast %28 : vector<16xf32> to vector<16x1xf32>
      %cst_23 = arith.constant 3.200000e+01 : f32
      %30 = vector.broadcast %cst_23 : f32 to vector<16x1xf32>
      %31 = arith.divf %29, %30 : vector<16x1xf32>
      %32 = vector.broadcast %24 : vector<16x1xf32> to vector<16x32xf32>
      %33 = arith.subf %18, %32 : vector<16x32xf32>
      %cst_24 = arith.constant 9.99999996E-13 : f32
      %34 = vector.broadcast %cst_24 : f32 to vector<16x1xf32>
      %35 = arith.addf %31, %34 : vector<16x1xf32>
      %36 = math.rsqrt %35 : vector<16x1xf32>
      %37 = vector.broadcast %36 : vector<16x1xf32> to vector<16x32xf32>
      %38 = arith.mulf %33, %37 : vector<16x32xf32>
      %39 = vector.broadcast %19 : vector<1x32xf32> to vector<16x32xf32>
      %40 = arith.mulf %38, %39 : vector<16x32xf32>
      %41 = vector.broadcast %20 : vector<1x32xf32> to vector<16x32xf32>
      %42 = arith.addf %40, %41 : vector<16x32xf32>
      %43 = arith.truncf %42 : vector<16x32xf32> to vector<16x32xbf16>
      %c0_25 = arith.constant 0 : index
      %c0_26 = arith.constant 0 : index
      %44 = vector.load %arg8[%c0_25, %c0_26] : memref<16x32xbf16, #tpu.memory_space<vmem>>, vector<16x32xbf16>
      tpu.vector_store %arg8[%c0_25, %c0_26], %43 {strides = array<i32>} : memref<16x32xbf16, #tpu.memory_space<vmem>>, vector<16x32xbf16>,
    } else {
    }
    return
  }
  func.func @transform_0(%arg0: i32, %arg1: i32) -> (i32, i32) {
    %c0_i32 = arith.constant 0 : i32
    return %arg0, %arg1 : i32, i32
  }
  func.func @transform_1(%arg0: i32, %arg1: i32) -> (i32, i32) {
    %c0_i32 = arith.constant 0 : i32
    %c0_i32_0 = arith.constant 0 : i32
    return %arg1, %c0_i32 : i32, i32
  }
  func.func @transform_2(%arg0: i32, %arg1: i32) -> (i32, i32) {
    %c0_i32 = arith.constant 0 : i32
    %c0_i32_0 = arith.constant 0 : i32
    %c0_i32_1 = arith.constant 0 : i32
    return %c0_i32, %c0_i32_0 : i32, i32
  }
  func.func @transform_3(%arg0: i32, %arg1: i32) -> (i32, i32) {
    %c0_i32 = arith.constant 0 : i32
    %c0_i32_0 = arith.constant 0 : i32
    return %arg0, %c0_i32 : i32, i32
  }
  func.func @transform_4(%arg0: i32, %arg1: i32) -> (i32, i32) {
    %c0_i32 = arith.constant 0 : i32
    %c0_i32_0 = arith.constant 0 : i32
    %c0_i32_1 = arith.constant 0 : i32
    return %c0_i32, %c0_i32_0 : i32, i32
  }
  func.func @transform_5(%arg0: i32, %arg1: i32) -> (i32, i32) {
    %c0_i32 = arith.constant 0 : i32
    %c0_i32_0 = arith.constant 0 : i32
    %c0_i32_1 = arith.constant 0 : i32
    return %c0_i32, %c0_i32_0 : i32, i32
  }
  func.func @transform_6(%arg0: i32, %arg1: i32) -> (i32, i32) {
    %c0_i32 = arith.constant 0 : i32
    %c0_i32_0 = arith.constant 0 : i32
    return %arg0, %c0_i32 : i32, i32
  }
}

module attributes {stable_mosaic.version = 11 : i64} {
  func.func @_ce_kernel(%arg0: i32, %arg1: memref<16x128xf32, #tpu.memory_space<vmem>>, %arg2: memref<16x1xi32, #tpu.memory_space<vmem>>, %arg3: memref<16x1xf32, #tpu.memory_space<vmem>>, %arg4: memref<1x1xf32, #tpu.memory_space<vmem>>, %arg5: memref<1x1xf32, #tpu.memory_space<vmem>>, %arg6: memref<1x1xf32, #tpu.memory_space<vmem>>) attributes {dimension_semantics = [#tpu.dimension_semantics<arbitrary>], iteration_bounds = array<i64: 1>, scalar_prefetch = 0 : i64, scratch_operands = 2 : i64, tpu.core_type = #tpu.core_type<tc>, window_params = [{transform_indices = @transform_0, window_bounds = array<i64: 16, 128>}, {transform_indices = @transform_1, window_bounds = array<i64: 16, 1>}, {transform_indices = @transform_2, window_bounds = array<i64: 16, 1>}, {pipeline_mode = #tpu.pipeline_mode<synchronous>, transform_indices = @transform_3, window_bounds = array<i64: 1, 1>}]} {
    %c0_i32 = arith.constant 0 : i32
    %0 = arith.cmpi eq, %arg0, %c0_i32 : i32
    %1 = arith.extui %0 : i1 to i32
    %c0_i32_0 = arith.constant 0 : i32
    %2 = arith.cmpi ne, %1, %c0_i32_0 : i32
    scf.if %2 {
      %cst_23 = arith.constant 0.000000e+00 : f32
      %50 = vector.broadcast %cst_23 : f32 to vector<1x1xf32>
      %c0_24 = arith.constant 0 : index
      %c0_25 = arith.constant 0 : index
      %51 = vector.load %arg5[%c0_24, %c0_25] : memref<1x1xf32, #tpu.memory_space<vmem>>, vector<1x1xf32>
      tpu.vector_store %arg5[%c0_24, %c0_25], %50 {strides = array<i32>} : memref<1x1xf32, #tpu.memory_space<vmem>>, vector<1x1xf32>,
      %cst_26 = arith.constant 0.000000e+00 : f32
      %52 = vector.broadcast %cst_26 : f32 to vector<1x1xf32>
      %c0_27 = arith.constant 0 : index
      %c0_28 = arith.constant 0 : index
      %53 = vector.load %arg6[%c0_27, %c0_28] : memref<1x1xf32, #tpu.memory_space<vmem>>, vector<1x1xf32>
      tpu.vector_store %arg6[%c0_27, %c0_28], %52 {strides = array<i32>} : memref<1x1xf32, #tpu.memory_space<vmem>>, vector<1x1xf32>,
    } else {
    }
    %c0 = arith.constant 0 : index
    %c0_1 = arith.constant 0 : index
    %3 = vector.load %arg1[%c0, %c0_1] : memref<16x128xf32, #tpu.memory_space<vmem>>, vector<16x128xf32>
    %c0_2 = arith.constant 0 : index
    %c0_3 = arith.constant 0 : index
    %4 = vector.load %arg2[%c0_2, %c0_3] : memref<16x1xi32, #tpu.memory_space<vmem>>, vector<16x1xi32>
    %c0_4 = arith.constant 0 : index
    %c0_5 = arith.constant 0 : index
    %5 = vector.load %arg3[%c0_4, %c0_5] : memref<16x1xf32, #tpu.memory_space<vmem>>, vector<16x1xf32>
    %6 = tpu.iota {dimensions = array<i32: 1>} : vector<16x128xi32>
    %c18_i32 = arith.constant 18 : i32
    %7 = vector.broadcast %c18_i32 : i32 to vector<16x128xi32>
    %8 = arith.cmpi slt, %6, %7 : vector<16x128xi32>
    %cst = arith.constant -1.000000e+30 : f32
    %9 = vector.broadcast %cst : f32 to vector<16x128xf32>
    %10 = arith.select %8, %3, %9 : vector<16x128xi1>, vector<16x128xf32>
    %cst_6 = arith.constant dense<0xFF800000> : vector<16xf32>
    %11 = vector.multi_reduction <maximumf>, %10, %cst_6 [1] : vector<16x128xf32> to vector<16xf32>
    %12 = vector.shape_cast %11 : vector<16xf32> to vector<16x1xf32>
    %13 = vector.broadcast %12 : vector<16x1xf32> to vector<16x128xf32>
    %14 = arith.subf %10, %13 : vector<16x128xf32>
    %15 = math.exp %14 : vector<16x128xf32>
    %cst_7 = arith.constant dense<0.000000e+00> : vector<16xf32>
    %16 = vector.multi_reduction <add>, %15, %cst_7 [1] : vector<16x128xf32> to vector<16xf32>
    %17 = vector.shape_cast %16 : vector<16xf32> to vector<16x1xf32>
    %18 = math.log %17 : vector<16x1xf32>
    %19 = arith.addf %18, %12 : vector<16x1xf32>
    %20 = vector.broadcast %4 : vector<16x1xi32> to vector<16x128xi32>
    %21 = arith.cmpi eq, %6, %20 : vector<16x128xi32>
    %22 = arith.andi %21, %8 : vector<16x128xi1>
    %cst_8 = arith.constant 1.000000e+00 : f32
    %cst_9 = arith.constant 0.000000e+00 : f32
    %23 = vector.broadcast %cst_8 : f32 to vector<16x128xf32>
    %24 = vector.broadcast %cst_9 : f32 to vector<16x128xf32>
    %25 = arith.select %22, %23, %24 : vector<16x128xi1>, vector<16x128xf32>
    %26 = arith.mulf %25, %3 : vector<16x128xf32>
    %cst_10 = arith.constant dense<0.000000e+00> : vector<16xf32>
    %27 = vector.multi_reduction <add>, %26, %cst_10 [1] : vector<16x128xf32> to vector<16xf32>
    %28 = vector.shape_cast %27 : vector<16xf32> to vector<16x1xf32>
    %29 = arith.subf %19, %28 : vector<16x1xf32>
    %30 = arith.mulf %29, %5 : vector<16x1xf32>
    %c0_11 = arith.constant 0 : index
    %c0_12 = arith.constant 0 : index
    %31 = vector.load %arg5[%c0_11, %c0_12] : memref<1x1xf32, #tpu.memory_space<vmem>>, vector<1x1xf32>
    %32 = vector.shape_cast %30 : vector<16x1xf32> to vector<1x16x1xf32>
    %cst_13 = arith.constant dense<0.000000e+00> : vector<1xf32>
    %33 = vector.multi_reduction <add>, %32, %cst_13 [1, 2] : vector<1x16x1xf32> to vector<1xf32>
    %34 = vector.shape_cast %33 : vector<1xf32> to vector<1x1x1xf32>
    %35 = vector.extract %34[0, 0, 0] : f32 from vector<1x1x1xf32>
    %36 = vector.broadcast %35 : f32 to vector<1x1xf32>
    %37 = arith.addf %31, %36 : vector<1x1xf32>
    %c0_14 = arith.constant 0 : index
    %c0_15 = arith.constant 0 : index
    %38 = vector.load %arg5[%c0_14, %c0_15] : memref<1x1xf32, #tpu.memory_space<vmem>>, vector<1x1xf32>
    tpu.vector_store %arg5[%c0_14, %c0_15], %37 {strides = array<i32>} : memref<1x1xf32, #tpu.memory_space<vmem>>, vector<1x1xf32>,
    %c0_16 = arith.constant 0 : index
    %c0_17 = arith.constant 0 : index
    %39 = vector.load %arg6[%c0_16, %c0_17] : memref<1x1xf32, #tpu.memory_space<vmem>>, vector<1x1xf32>
    %40 = vector.shape_cast %5 : vector<16x1xf32> to vector<1x16x1xf32>
    %cst_18 = arith.constant dense<0.000000e+00> : vector<1xf32>
    %41 = vector.multi_reduction <add>, %40, %cst_18 [1, 2] : vector<1x16x1xf32> to vector<1xf32>
    %42 = vector.shape_cast %41 : vector<1xf32> to vector<1x1x1xf32>
    %43 = vector.extract %42[0, 0, 0] : f32 from vector<1x1x1xf32>
    %44 = vector.broadcast %43 : f32 to vector<1x1xf32>
    %45 = arith.addf %39, %44 : vector<1x1xf32>
    %c0_19 = arith.constant 0 : index
    %c0_20 = arith.constant 0 : index
    %46 = vector.load %arg6[%c0_19, %c0_20] : memref<1x1xf32, #tpu.memory_space<vmem>>, vector<1x1xf32>
    tpu.vector_store %arg6[%c0_19, %c0_20], %45 {strides = array<i32>} : memref<1x1xf32, #tpu.memory_space<vmem>>, vector<1x1xf32>,
    %c0_i32_21 = arith.constant 0 : i32
    %47 = arith.cmpi eq, %arg0, %c0_i32_21 : i32
    %48 = arith.extui %47 : i1 to i32
    %c0_i32_22 = arith.constant 0 : i32
    %49 = arith.cmpi ne, %48, %c0_i32_22 : i32
    scf.if %49 {
      %c0_23 = arith.constant 0 : index
      %c0_24 = arith.constant 0 : index
      %50 = vector.load %arg5[%c0_23, %c0_24] : memref<1x1xf32, #tpu.memory_space<vmem>>, vector<1x1xf32>
      %c0_25 = arith.constant 0 : index
      %c0_26 = arith.constant 0 : index
      %51 = vector.load %arg6[%c0_25, %c0_26] : memref<1x1xf32, #tpu.memory_space<vmem>>, vector<1x1xf32>
      %52 = arith.divf %50, %51 : vector<1x1xf32>
      %c0_27 = arith.constant 0 : index
      %c0_28 = arith.constant 0 : index
      %53 = vector.load %arg4[%c0_27, %c0_28] : memref<1x1xf32, #tpu.memory_space<vmem>>, vector<1x1xf32>
      tpu.vector_store %arg4[%c0_27, %c0_28], %52 {strides = array<i32>} : memref<1x1xf32, #tpu.memory_space<vmem>>, vector<1x1xf32>,
    } else {
    }
    return
  }
  func.func @transform_0(%arg0: i32) -> (i32, i32) {
    %c0_i32 = arith.constant 0 : i32
    %c0_i32_0 = arith.constant 0 : i32
    return %arg0, %c0_i32 : i32, i32
  }
  func.func @transform_1(%arg0: i32) -> (i32, i32) {
    %c0_i32 = arith.constant 0 : i32
    %c0_i32_0 = arith.constant 0 : i32
    return %arg0, %c0_i32 : i32, i32
  }
  func.func @transform_2(%arg0: i32) -> (i32, i32) {
    %c0_i32 = arith.constant 0 : i32
    %c0_i32_0 = arith.constant 0 : i32
    return %arg0, %c0_i32 : i32, i32
  }
  func.func @transform_3(%arg0: i32) -> (i32, i32) {
    %c0_i32 = arith.constant 0 : i32
    %c0_i32_0 = arith.constant 0 : i32
    %c0_i32_1 = arith.constant 0 : i32
    return %c0_i32, %c0_i32_0 : i32, i32
  }
}

</mosaic_0001>

<bundles_post_ra>
// kernel: bert_token_classification_forward.13
= control target key start
LH: loop header
LB: loop body
LE: loop exit
PB: predicated region body
PF: predicated region fallthrough
CT: control target
= control target key end

     0   :  { %vm18_vm0 = vcmask 261120   ;;  %vm70_vm1 = vcmask 257024   ;;  %s129_s0 = inlined_call_operand.vmem [shape: f32[16,32], index: 0, kind: input, shape index: {}]   ;;  %s130_s1 = inlined_call_operand.vmem [shape: f32[1,32], index: 1, kind: input, shape index: {}]   ;;  %s131_s2 = inlined_call_operand.vmem [shape: f32[1,32], index: 2, kind: input, shape index: {}]   ;;  %s132_s3 = inlined_call_operand.vmem [shape: bf16[16,32], index: 3, kind: output, shape index: {}]  }
   0x1   :  { %v14_v0 = vld [vmem:[%s129_s0] sm:$0xff]  ;;  %v15_v1 = vld [vmem:[%s129_s0 + $0x8] sm:$0xff] }
   0x2   :  { %v19_v2 = vsel %vm18_vm0, %v14_v0, 0.0  ;;  %v22_v3 = vsel %vm18_vm0, %v15_v1, 0.0  ;;  %v77_v21 = vld [vmem:[%s130_s1] ss:$0 sm:$0xff] }
   0x3   :  { %20 = vadd.xlane.f32.xlu0 %v19_v2  ;;  %v78_v23 = vld [vmem:[%s131_s2] ss:$0 sm:$0xff] }
   0x7   :  { %23 = vadd.xlane.f32.xlu0 %v22_v3 }
  0x90   :  { %v21_v4 = vpop.xlane.xlu0 %20 }
  0x91   :  { %v26_v5 = vmul.f32 0.03125, %v21_v4 }
  0x93   :  { %v28_v6 = vsub.f32 %v14_v0, %v26_v5 }
  0x94   :  { %v24_v7 = vpop.xlane.xlu0 %23 }
  0x95   :  { %v27_v8 = vmul.f32 0.03125, %v24_v7  ;;  %v30_v9 = vmul.f32 %v28_v6, %v28_v6 }
  0x97   :  { %v29_v10 = vsub.f32 %v15_v1, %v27_v8  ;;  %v32_v11 = vsel %vm18_vm0, %v30_v9, 0.0 }
  0x98   :  { %33 = vadd.xlane.f32.xlu1 %v32_v11 }
  0x99   :  { %v31_v12 = vmul.f32 %v29_v10, %v29_v10 }
  0x9b   :  { %v35_v13 = vsel %vm18_vm0, %v31_v12, 0.0 }
  0x9c   :  { %36 = vadd.xlane.f32.xlu1 %v35_v13 }
 0x125   :  { %v34_v14 = vpop.xlane.xlu1 %33 }
 0x126   :  { %v38_v15 = vmul.f32 0.03125, %v34_v14 }
 0x128   :  { %v40_v16 = vadd.f32 1e-12, %v38_v15 }
 0x129   :  { %v37_v17 = vpop.xlane.xlu1 %36 }
 0x12a   :  { %83 = vrsqrt.f32 %v40_v16  ;;  %v39_v18 = vmul.f32 0.03125, %v37_v17 }
 0x12c   :  { %v41_v19 = vadd.f32 1e-12, %v39_v18 }
 0x12e   :  { %85 = vrsqrt.f32 %v41_v19 }
 0x134   :  { %v84_v20 = vpop.eup %83 }
 0x135   :  { %v44_v22 = vmul.f32 %v84_v20, %v28_v6 }
 0x137   :  { %v52_v24 = vmul.f32 %v77_v21, %v44_v22 }
 0x138   :  { %v86_v25 = vpop.eup %85 }
 0x139   :  { %v60_v26 = vadd.f32 %v78_v23, %v52_v24  ;;  %v45_v27 = vmul.f32 %v86_v25, %v29_v10 }
 0x13b   :  { %v81_v28 = vpack.c.bf16 %v60_v26, %v60_v26  ;;  %v53_v29 = vmul.f32 %v77_v21, %v45_v27 }
 0x13d   :  { %71 = vst.msk [vmem:[%s132_s3] sm:$0xf] %vm70_vm1, %v81_v28  ;;  %v61_v30 = vadd.f32 %v78_v23, %v53_v29 }
 0x13f   :  { %v82_v31 = vpack.c.bf16 %v61_v30, %v61_v30 }
 0x141   :  { %72 = vst.msk [vmem:[%s132_s3 + $0x4] sm:$0xf] %vm70_vm1, %v82_v31 }

// kernel: bert_token_classification_forward.14
= control target key start
LH: loop header
LB: loop body
LE: loop exit
PB: predicated region body
PF: predicated region fallthrough
CT: control target
= control target key end

     0   :  { %vm19_vm0 = vcmask 785408   ;;  %v175_v0 = vmov 0.0   ;;  %vm176_vm1 = vmmov 0   ;;  %vm47_vm2 = vcmask 261120   ;;  %s178_s21 = smov 96   ;;  %s239_s1 = inlined_call_operand.vmem [shape: bf16[32,96], index: 1, kind: input, shape index: {}]   ;;  %s240_s0 = inlined_call_operand.vmem [shape: bf16[16,32], index: 0, kind: input, shape index: {}]   ;;  %s241_s2 = inlined_call_operand.vmem [shape: f32[1,96], index: 2, kind: input, shape index: {}]   ;;  %s242_s3 = inlined_call_operand.vmem [shape: bf16[3,16,32], index: 3, kind: output, shape index: {}]  }
   0x1   :  { %160 = vmatprep.subr.bf16.mxu0 %v175_v0  ;;  %v172_v1 = vld [vmem:[%s239_s1] sm:$0xff]   ;;  %164 = vmatprep.mubr.msk.bf16.mxu0 %vm176_vm1, %v175_v0  ;;  %20 = vst.msk [vmem:[#allocation2] sm:$0xff] %vm19_vm0, %v175_v0  ;;  %21 = vst.msk [vmem:[#allocation2 + $0x8] sm:$0xff] %vm19_vm0, %v175_v0  ;;  %v173_v2 = vld [vmem:[%s239_s1 + $0x8] sm:$0xff]   ;;  %vm119_vm3 = vcmask 257024  }
   0x2   :  { %161 = vmatpush3.bf16.msra.mxu0 %v172_v1  ;;  %v174_v3 = vld [vmem:[%s240_s0] sm:$0xff]   ;;  %s177_s0 = smov 64  }
   0x3   :  { %162 = vmatprep.subr.bf16.mxu0 %v175_v0  ;;  %v148_v12 = vld [vmem:[%s241_s2] ss:$0 sm:$0xff] }
   0x6   :  { %163 = vmatpush3.bf16.msra.mxu0 %v173_v2 }
   0x8   :  { %v22_v4 = vld [vmem:[#allocation2] sm:$0xff]  ;;  %v23_v6 = vld [vmem:[#allocation2 + $0x8] sm:$0xff] }
   0x9   :  { %165 = vmatmul.mubr.msk.bf16.vlgmr.msra.gmra.mrb[0].mxu0 %vm47_vm2, %v174_v3 }
  0xdc   :  { %v85_v5 = vpop.f32.mrb[0].mxu0 }
  0xdd   :  { %v92_v7 = vadd.f32 %v85_v5, %v22_v4  ;;  %v166_v8 = vpop.f32.mrb[1].mxu0 }
  0xde   :  { %v88_v9 = vpop.f32.mrb[2].mxu0 }
  0xdf   :  { %95 = vst.msk [vmem:[#allocation2] sm:$0xff] %vm19_vm0, %v92_v7  ;;  %v93_v10 = vadd.f32 %v88_v9, %v23_v6  ;;  %v167_v11 = vpop.f32.mrb[3].mxu0 }
  0xe1   :  { %96 = vst.msk [vmem:[#allocation2 + $0x8] sm:$0xff] %vm19_vm0, %v93_v10 }
  0xe6   :  { %v100_v13 = vld [vmem:[#allocation2] sm:$0xff] }
  0xe7   :  { %v109_v14 = vadd.f32 %v148_v12, %v100_v13 }
  0xe8   :  { %v101_v15 = vld [vmem:[#allocation2 + $0x8] sm:$0xff] }
  0xe9   :  { %v155_v16 = vpack.c.bf16 %v109_v14, %v109_v14  ;;  %v110_v17 = vadd.f32 %v148_v12, %v101_v15 }
  0xeb   :  { %131 = vrot.lane.b32.xlu1 %v155_v16, %s177_s0  ;;  %120 = vst.msk [vmem:[%s242_s3] sm:$0xf] %vm119_vm3, %v155_v16  ;;  %122 = vrot.lane.b32.xlu0 %v155_v16, %s178_s21  ;;  %v156_v18 = vpack.c.bf16 %v110_v17, %v110_v17 }
  0xed   :  { %121 = vst.msk [vmem:[%s242_s3 + $0x4] sm:$0xf] %vm119_vm3, %v156_v18 }
  0xef   :  { %133 = vrot.lane.b32.xlu1 %v156_v18, %s177_s0  ;;  %124 = vrot.lane.b32.xlu0 %v156_v18, %s178_s21 }
 0x15d   :  { %v132_v19 = vpop.permute.xlu1 %131  ;;  %v123_v20 = vpop.permute.xlu0 %122 }
 0x15e   :  { %153 = vst.msk [vmem:[%s242_s3 + $0x10] sm:$0xf] %vm119_vm3, %v132_v19  ;;  %151 = vst.msk [vmem:[%s242_s3 + $0x8] sm:$0xf] %vm119_vm3, %v123_v20 }
 0x161   :  { %v134_v21 = vpop.permute.xlu1 %133  ;;  %v125_v22 = vpop.permute.xlu0 %124 }
 0x162   :  { %154 = vst.msk [vmem:[%s242_s3 + $0x14] sm:$0xf] %vm119_vm3, %v134_v21  ;;  %152 = vst.msk [vmem:[%s242_s3 + $0xc] sm:$0xf] %vm119_vm3, %v125_v22 }

// kernel: bert_token_classification_forward.16
= control target key start
LH: loop header
LB: loop body
LE: loop exit
PB: predicated region body
PF: predicated region fallthrough
CT: control target
= control target key end

     0   :  { %vm28_vm0 = vcmask 261120   ;;  %v220_v0 = vmov 0.0   ;;  %vm221_vm1 = vmmov 0   ;;  %vm178_vm2 = vcmask 257024   ;;  %s293_s1 = inlined_call_operand.vmem [shape: bf16[32,32], index: 1, kind: input, shape index: {}]   ;;  %s294_s0 = inlined_call_operand.vmem [shape: bf16[16,32], index: 0, kind: input, shape index: {}]   ;;  %s295_s3 = inlined_call_operand.vmem [shape: bf16[16,32], index: 3, kind: input, shape index: {}]   ;;  %s296_s2 = inlined_call_operand.vmem [shape: f32[1,32], index: 2, kind: input, shape index: {}]   ;;  %s297_s4 = inlined_call_operand.vmem [shape: f32[1,32], index: 4, kind: input, shape index: {}]   ;;  %s298_s5 = inlined_call_operand.vmem [shape: f32[1,32], index: 5, kind: input, shape index: {}]   ;;  %s299_s6 = inlined_call_operand.vmem [shape: bf16[16,32], index: 6, kind: output, shape index: {}]  }
   0x1   :  { %203 = vmatprep.subr.bf16.mxu0 %v220_v0  ;;  %v213_v1 = vld [vmem:[%s293_s1] sm:$0xff]   ;;  %207 = vmatprep.mubr.msk.bf16.mxu0 %vm221_vm1, %v220_v0  ;;  %29 = vst.msk [vmem:[#allocation2] sm:$0xff] %vm28_vm0, %v220_v0  ;;  %30 = vst.msk [vmem:[#allocation2 + $0x8] sm:$0xff] %vm28_vm0, %v220_v0  ;;  %v214_v2 = vld [vmem:[%s293_s1 + $0x8] sm:$0xff]  }
   0x2   :  { %204 = vmatpush3.bf16.msra.mxu0 %v213_v1  ;;  %v215_v3 = vld [vmem:[%s294_s0] sm:$0xff]  }
   0x3   :  { %205 = vmatprep.subr.bf16.mxu0 %v220_v0  ;;  %v197_v12 = vld [vmem:[%s295_s3] sm:$0xff]  }
   0x4   :  { %v189_v13 = vld [vmem:[%s296_s2] ss:$0 sm:$0xff]  ;;  %v198_v14 = vunpack.c.l.bf16 %v197_v12  ;;  %v199_v17 = vunpack.c.h.bf16 %v197_v12 }
   0x5   :  { %v190_v41 = vld [vmem:[%s297_s4] ss:$0 sm:$0xff] }
   0x6   :  { %206 = vmatpush3.bf16.msra.mxu0 %v214_v2  ;;  %v191_v43 = vld [vmem:[%s298_s5] ss:$0 sm:$0xff] }
   0x8   :  { %v31_v4 = vld [vmem:[#allocation2] sm:$0xff]  ;;  %v32_v6 = vld [vmem:[#allocation2 + $0x8] sm:$0xff] }
   0x9   :  { %208 = vmatmul.mubr.msk.bf16.vlgmr.msra.gmra.mrb[0].mxu0 %vm28_vm0, %v215_v3 }
  0xdc   :  { %v94_v5 = vpop.f32.mrb[0].mxu0 }
  0xdd   :  { %v101_v7 = vadd.f32 %v94_v5, %v31_v4  ;;  %v209_v8 = vpop.f32.mrb[1].mxu0 }
  0xde   :  { %v97_v9 = vpop.f32.mrb[2].mxu0 }
  0xdf   :  { %103 = vst.msk [vmem:[#allocation2] sm:$0xff] %vm28_vm0, %v101_v7  ;;  %v102_v10 = vadd.f32 %v97_v9, %v32_v6  ;;  %v210_v11 = vpop.f32.mrb[3].mxu0 }
  0xe1   :  { %104 = vst.msk [vmem:[#allocation2 + $0x8] sm:$0xff] %vm28_vm0, %v102_v10 }
  0xe6   :  { %v108_v15 = vld [vmem:[#allocation2] sm:$0xff] }
  0xe7   :  { %v117_v16 = vadd.f32 %v189_v13, %v108_v15 }
  0xe8   :  { %v109_v18 = vld [vmem:[#allocation2 + $0x8] sm:$0xff] }
  0xe9   :  { %v123_v19 = vadd.f32 %v198_v14, %v117_v16  ;;  %v118_v20 = vadd.f32 %v189_v13, %v109_v18 }
  0xeb   :  { %v127_v21 = vsel %vm28_vm0, %v123_v19, 0.0  ;;  %v124_v22 = vadd.f32 %v199_v17, %v118_v20 }
  0xec   :  { %128 = vadd.xlane.f32.xlu0 %v127_v21 }
  0xed   :  { %v130_v23 = vsel %vm28_vm0, %v124_v22, 0.0 }
  0xf0   :  { %131 = vadd.xlane.f32.xlu0 %v130_v23 }
 0x179   :  { %v129_v24 = vpop.xlane.xlu0 %128 }
 0x17a   :  { %v134_v25 = vmul.f32 0.03125, %v129_v24 }
 0x17c   :  { %v136_v26 = vsub.f32 %v123_v19, %v134_v25 }
 0x17d   :  { %v132_v27 = vpop.xlane.xlu0 %131 }
 0x17e   :  { %v135_v28 = vmul.f32 0.03125, %v132_v27  ;;  %v138_v29 = vmul.f32 %v136_v26, %v136_v26 }
 0x180   :  { %v137_v30 = vsub.f32 %v124_v22, %v135_v28  ;;  %v140_v31 = vsel %vm28_vm0, %v138_v29, 0.0 }
 0x181   :  { %141 = vadd.xlane.f32.xlu1 %v140_v31 }
 0x182   :  { %v139_v32 = vmul.f32 %v137_v30, %v137_v30 }
 0x184   :  { %v143_v33 = vsel %vm28_vm0, %v139_v32, 0.0 }
 0x185   :  { %144 = vadd.xlane.f32.xlu1 %v143_v33 }
 0x20e   :  { %v142_v34 = vpop.xlane.xlu1 %141 }
 0x20f   :  { %v146_v35 = vmul.f32 0.03125, %v142_v34 }
 0x211   :  { %v148_v36 = vadd.f32 1e-12, %v146_v35 }
 0x212   :  { %v145_v37 = vpop.xlane.xlu1 %144 }
 0x213   :  { %216 = vrsqrt.f32 %v148_v36  ;;  %v147_v38 = vmul.f32 0.03125, %v145_v37 }
 0x215   :  { %v149_v39 = vadd.f32 1e-12, %v147_v38 }
 0x217   :  { %218 = vrsqrt.f32 %v149_v39 }
 0x21d   :  { %v217_v40 = vpop.eup %216 }
 0x21e   :  { %v152_v42 = vmul.f32 %v217_v40, %v136_v26 }
 0x220   :  { %v160_v44 = vmul.f32 %v190_v41, %v152_v42 }
 0x221   :  { %v219_v45 = vpop.eup %218 }
 0x222   :  { %v168_v46 = vadd.f32 %v191_v43, %v160_v44  ;;  %v153_v47 = vmul.f32 %v219_v45, %v137_v30 }
 0x224   :  { %v194_v48 = vpack.c.bf16 %v168_v46, %v168_v46  ;;  %v161_v49 = vmul.f32 %v190_v41, %v153_v47 }
 0x226   :  { %179 = vst.msk [vmem:[%s299_s6] sm:$0xf] %vm178_vm2, %v194_v48  ;;  %v169_v50 = vadd.f32 %v191_v43, %v161_v49 }
 0x228   :  { %v195_v51 = vpack.c.bf16 %v169_v50, %v169_v50 }
 0x22a   :  { %180 = vst.msk [vmem:[%s299_s6 + $0x4] sm:$0xf] %vm178_vm2, %v195_v51 }

// kernel: bert_token_classification_forward.15
= control target key start
LH: loop header
LB: loop body
LE: loop exit
PB: predicated region body
PF: predicated region fallthrough
CT: control target
= control target key end

     0   :  { %s891_s15 = smov 0   ;;  %s893_s16 = smov 0   ;;  %s972_s0 = inlined_call_operand.vmem [shape: bf16[3,16,32], index: 0, kind: input, shape index: {}, may-alias: {0,1,2}]   ;;  %s973_s1 = inlined_call_operand.vmem [shape: bf16[3,16,32], index: 1, kind: input, shape index: {}, may-alias: {0,1,2}]   ;;  %s974_s2 = inlined_call_operand.vmem [shape: bf16[3,16,32], index: 2, kind: input, shape index: {}, may-alias: {0,1,2}]   ;;  %s975_s3 = inlined_call_operand.vmem [shape: f32[2,1,8], index: 3, kind: input, shape index: {}]   ;;  %s976_s4 = inlined_call_operand.vmem [shape: bf16[16,32], index: 4, kind: output, shape index: {}]  }
   0x1   :  { %s895_s17 = smov 0  }
   0x2 LB: > { %s33_s18 = sadd.s32 1, %s853_s16  ;;  %p741_p0 = scmp.ge.s32.totalorder %s857_s17, 1  ;;  %s857_s17 = sphi %s895_s17, %s14_s17   ;;  %s853_s16 = sphi %s893_s16, %s978_s16   ;;  %s849_s15 = sphi %s891_s15, %s977_s15  }
   0x3   : > { %p35_p1 = scmp.ge.s32.totalorder %s33_s18, 2  ;;  %p227_p2 = scmp.lt.s32.totalorder %s857_s17, 3 }
   0x5   : > { %s980_s18 = smov (%p35_p1, %s33_s18), 0  ;;  %p228_p3 = pnand %p741_p0, %p227_p2 }
   0x6   : > { %p272_p4 = scmp.lt.s32.totalorder (!%p228_p3), %s849_s15, 1  ;;  %v859_v0 = vmov (!%p228_p3), 0.0   ;;  %vm860_vm0 = vmmov (!%p228_p3), 0   ;;  %vm323_vm1 = vcmask (!%p228_p3), 130048   ;;  %vm308_vm2 = vcmask (!%p228_p3), 15360   ;;  %s863_s29 = smov (!%p228_p3), 112  }
   0x7   : > { %231 = sbr.rel (%p228_p3) target bundleno = 1391 (0x56f), region = 36  ;;  %766 = vmatprep.subr.bf16.mxu0 (!%p228_p3), %v859_v0  ;;  %768 = vmatprep.mubr.msk.bf16.mxu0 (!%p228_p3), %vm860_vm0, %v859_v0  ;;  %v861_v4 = vmov (!%p228_p3), -inf   ;;  %310 = vst.msk [vmem:[#allocation3] sm:$0xff] (!%p228_p3), %vm308_vm2, %v859_v0  ;;  %vm371_vm3 = vcmask (!%p228_p3), 64512   ;;  %v862_v12 = vmov (!%p228_p3), 0   ;;  %vm393_vm4 = vcmask (!%p228_p3), 7168  }
   0x8   : > { %772 = vmatprep.subr.bf16.mxu1 (!%p228_p3), %v859_v0  ;;  %774 = vmatprep.mubr.msk.bf16.mxu1 (!%p228_p3), %vm860_vm0, %v859_v0  ;;  %309 = vst.msk [vmem:[#allocation2] sm:$0xff] (!%p228_p3), %vm308_vm2, %v861_v4  ;;  %vm406_vm5 = vcmask (!%p228_p3), 1043456   ;;  %vm311_vm6 = vcmask (!%p228_p3), 261120   ;;  %v864_v53 = vmov (!%p228_p3), 1   ;;  %vm531_vm7 = vcmask (!%p228_p3), 15368   ;;  %s865_s7 = smov (!%p228_p3), 16  }
   0x9   : > { %821 = vset.pattern.permute.xlu0 (!%p228_p3), %v862_v12  ;;  %312 = vst.msk [vmem:[#allocation4] sm:$0xff] (!%p228_p3), %vm311_vm6, %v859_v0  ;;  %822 = vset.pattern.permute.xlu1 (!%p228_p3), %v864_v53  ;;  %vm597_vm8 = vcmask (!%p228_p3), 261248   ;;  %vm613_vm9 = vcmask (!%p228_p3), 125952   ;;  %vm625_vm10 = vcmask (!%p228_p3), 257152  }
   0xe   : > { %s982_s15 = smov (!%p272_p4, %s849_s15), 1  ;;  %v387_v35 = vld [vmem:[#allocation3] sm:$0xff] }
   0xf   : > { %s915_s19 = sshll.u32 %s982_s15, 2  ;;  %s296_s28 = scalar_lea.vmem %s975_s3, %s982_s15  ;;  %v370_v15 = vld [vmem:[#allocation2] sm:$0xff] }
  0x10   : > { %s674_s22 = scalar_lea.vmem %s973_s1, %s915_s19  ;;  %s275_s25 = scalar_lea.vmem %s972_s0, %s915_s19  ;;  %v934_v5 = vld [vmem:[%s296_s28] ss:$0 sm:$0xff]  ;;  %v395_v39 = vld [vmem:[#allocation4] sm:$0xff] }
  0x11   : > { %v746_v1 = vld [vmem:[%s674_s22 + $0x8] sm:$0xf]  ;;  %v314_v3 = vld [vmem:[%s275_s25] sm:$0xf]  ;;  %s677_s6 = scalar_lea.vmem %s974_s2, %s915_s19  ;;  %s301_s10 = scalar_lea.vmem %s976_s4, %s915_s19 }
  0x12   : > { %v328_v2 = vsel %vm323_vm1, %v746_v1, 0  ;;  %v752_v13 = vcombine.low %v746_v1, %v746_v1  ;;  %v751_v14 = vcombine.low %v314_v3, %v314_v3  ;;  %v747_v17 = vld [vmem:[%s677_s6 + $0x10] sm:$0xf] }
  0x13   : > { %767 = vmatpush3.bf16.xpose.msra.mxu0 %v328_v2  ;;  %v754_v20 = vcombine.low %v747_v17, %v747_v17  ;;  %v408_v21 = vsel %vm406_vm5, %v747_v17, 0 }
  0x14   : > { %784 = vmatprep.subr.bf16.mxu0 %v859_v0  ;;  %461 = vrot.lane.b32.xlu1 %v752_v13, %s863_s29 }
  0x15   : > { %773 = vmatpush3.bf16.msra.mxu1 %v408_v21 }
  0x16   : > { %778 = vmatprep.subr.bf16.mxu1 %v859_v0 }
  0x18   : > { %456 = vrot.lane.b32.xlu1 %v751_v14, %s863_s29 }
  0x1a   : > { %769 = vmatmul.mubr.msk.bf16.vlgmr.msra.gmra.mrb[0].mxu0 %vm323_vm1, %v314_v3 }
  0x1b   : > { %786 = vmatprep.mubr.msk.bf16.mxu0 %vm860_vm0, %v859_v0 }
  0x86   : > { %v462_v27 = vpop.permute.xlu1 %461 }
  0x87   : > { %v467_v29 = vsel %vm323_vm1, %v462_v27, 0 }
  0x8a   : > { %v457_v32 = vpop.permute.xlu1 %456 }
  0xed   : > { %v364_v6 = vpop.f32.mrb[0].mxu0 }
  0xee   : > { %v365_v7 = vadd.f32 %v934_v5, %v364_v6  ;;  %v770_v8 = vpop.f32.mrb[1].mxu0 }
  0xef   : > { %v367_v9 = vpop.f32.mrb[2].mxu0 }
  0xf0   : > { %v771_v10 = vpop.f32.mrb[3].mxu0  ;;  %v372_v11 = vsel %vm371_vm3, %v365_v7, -inf }
  0xf1   : > { %373 = vmax.xlane.f32.xlu0 %v372_v11 }
 0x17e   : > { %v374_v16 = vpop.xlane.xlu0 %373 }
 0x17f   : > { %v375_v18 = vmax.f32 %v370_v15, %v374_v16 }
 0x181   : > { %v376_v19 = vsub.f32 %v370_v15, %v375_v18  ;;  %452 = vst.msk [vmem:[#allocation2] sm:$0xff] %vm393_vm4, %v375_v18  ;;  %381 = vperm.xlu0 %821, %v375_v18  }
 0x183   : > { %v377_v33 = vmul.f32 1.442695, %v376_v19 }
 0x185   : > { %544 = vrot.lane.b32.xlu0 %v754_v20, %s863_s29 }
 0x188   : > { %v509_v55 = vld [vmem:[#allocation2] sm:$0xff] }
 0x200   : > { %v382_v22 = vpop.permute.xlu0 %381 }
 0x201   : > { %v384_v23 = vsub.f32 %v365_v7, %v382_v22 }
 0x203   : > { %v385_v24 = vmul.f32 1.442695, %v384_v23 }
 0x204   : > { %v545_v25 = vpop.permute.xlu0 %544 }
 0x205   : > { %825 = vpow2.f32 %v385_v24  ;;  %v550_v26 = vsel %vm406_vm5, %v545_v25, 0 }
 0x206   : > { %785 = vmatpush3.bf16.msra.mxu0 %v550_v26  ;;  %827 = vpow2.f32 %v377_v33 }
 0x20f   : > { %v826_v28 = vpop.eup %825 }
 0x210   : > { %v389_v30 = vsel %vm371_vm3, %v826_v28, 0.0  ;;  %v402_v31 = vpack.c.bf16 %v826_v28, %v826_v28  ;;  %v828_v34 = vpop.eup %827 }
 0x211   : > { %390 = vadd.xlane.f32.xlu0 %v389_v30  ;;  %v388_v36 = vmul.f32 %v828_v34, %v387_v35 }
 0x212   : > { %775 = vmatmul.mubr.msk.bf16.vlgmr.msra.gmra.mrb[0].mxu1 %vm371_vm3, %v402_v31 }
 0x213   : > { %779 = vmatpush3.bf16.xpose.msra.mxu1 %v467_v29  ;;  %780 = vmatprep.mubr.msk.bf16.mxu1 %vm860_vm0, %v859_v0 }
 0x21a   : > { %781 = vmatmul.mubr.msk.bf16.vlgmr.msra.gmra.mrb[4].mxu1 %vm323_vm1, %v457_v32 }
 0x227   : > { %398 = vperm.xlu0 %821, %v828_v34  }
 0x29e   : > { %v391_v37 = vpop.xlane.xlu0 %390 }
 0x29f   : > { %v392_v38 = vadd.f32 %v391_v37, %v388_v36 }
 0x2a1   : > { %394 = vst.msk [vmem:[#allocation3] sm:$0xff] %vm393_vm4, %v392_v38 }
 0x2a6   : > { %v399_v40 = vpop.permute.xlu0 %398 }
 0x2a7   : > { %v401_v41 = vmul.f32 %v399_v40, %v395_v39 }
 0x2a8   : > { %v525_v2 = vld [vmem:[#allocation3] sm:$0xff] }
 0x2e5   : > { %v444_v42 = vpop.f32.mrb[0].mxu1 }
 0x2e6   : > { %v450_v43 = vadd.f32 %v444_v42, %v401_v41  ;;  %v776_v44 = vpop.f32.mrb[1].mxu1 }
 0x2e7   : > { %v447_v45 = vpop.f32.mrb[2].mxu1 }
 0x2e8   : > { %451 = vst.msk [vmem:[#allocation4] sm:$0xff] %vm323_vm1, %v450_v43  ;;  %v777_v46 = vpop.f32.mrb[3].mxu1 }
 0x2ed   : > { %v503_v47 = vpop.f32.mrb[4].mxu1 }
 0x2ee   : > { %v504_v48 = vadd.f32 %v934_v5, %v503_v47  ;;  %v782_v49 = vpop.f32.mrb[5].mxu1 }
 0x2ef   : > { %v506_v50 = vpop.f32.mrb[6].mxu1  ;;  %v533_v14 = vld [vmem:[#allocation4] sm:$0xff] }
 0x2f0   : > { %v783_v51 = vpop.f32.mrb[7].mxu1  ;;  %v510_v52 = vsel %vm371_vm3, %v504_v48, -inf }
 0x2f1   : > { %511 = vmax.xlane.f32.xlu1 %v510_v52 }
 0x37e   : > { %v512_v54 = vpop.xlane.xlu1 %511 }
 0x37f   : > { %v513_v56 = vmax.f32 %v509_v55, %v512_v54 }
 0x381   : > { %v514_v57 = vsub.f32 %v509_v55, %v513_v56  ;;  %599 = vst.msk [vmem:[#allocation2] sm:$0xff] %vm531_vm7, %v513_v56  ;;  %519 = vperm.xlu1 %822, %v513_v56  }
 0x383   : > { %v515_v0 = vmul.f32 1.442695, %v514_v57 }
 0x400   : > { %v520_v58 = vpop.permute.xlu1 %519 }
 0x401   : > { %v522_v59 = vsub.f32 %v504_v48, %v520_v58 }
 0x403   : > { %v523_v60 = vmul.f32 1.442695, %v522_v59 }
 0x405   : > { %829 = vpow2.f32 %v523_v60 }
 0x406   : > { %831 = vpow2.f32 %v515_v0 }
 0x40f   : > { %v830_v61 = vpop.eup %829 }
 0x410   : > { %v527_v62 = vsel %vm371_vm3, %v830_v61, 0.0  ;;  %v540_v63 = vpack.c.bf16 %v830_v61, %v830_v61  ;;  %v832_v1 = vpop.eup %831 }
 0x411   : > { %528 = vadd.xlane.f32.xlu1 %v527_v62  ;;  %v526_v3 = vmul.f32 %v832_v1, %v525_v2 }
 0x412   : > { %787 = vmatmul.mubr.msk.bf16.vlgmr.msra.gmra.mrb[4].mxu0 %vm371_vm3, %v540_v63 }
 0x422   : > { %536 = vperm.xlu1 %822, %v832_v1  }
 0x49e   : > { %v529_v4 = vpop.xlane.xlu1 %528 }
 0x49f   : > { %v530_v5 = vadd.f32 %v529_v4, %v526_v3 }
 0x4a1   : > { %532 = vst.msk [vmem:[#allocation3] sm:$0xff] %vm531_vm7, %v530_v5 }
 0x4a2   : > { %v537_v12 = vpop.permute.xlu1 %536 }
 0x4a3   : > { %v539_v15 = vmul.f32 %v537_v12, %v533_v14 }
 0x4a8   : > { %v603_v6 = vld [vmem:[#allocation3] sm:$0xff] }
 0x4a9   : > { %833 = vrcp.f32 %v603_v6 }
 0x4b3   : > { %v834_v7 = vpop.eup %833 }
 0x4b4   : > { %608 = vperm.xlu0 %821, %v834_v7  }
 0x4b8   : > { %823 = vset.pattern.permute.xlu0 %v864_v53 }
 0x4e5   : > { %v586_v8 = vpop.f32.mrb[4].mxu0 }
 0x4e6   : > { %593 = vrot.lane.b32.xlu0 %v586_v8, %s865_s7  ;;  %v788_v9 = vpop.f32.mrb[5].mxu0 }
 0x4e7   : > { %v589_v10 = vpop.f32.mrb[6].mxu0 }
 0x4e8   : > { %v789_v11 = vpop.f32.mrb[7].mxu0 }
 0x4ea   : > { %620 = vperm.xlu0 %823, %v834_v7  }
 0x533   : > { %v609_v13 = vpop.permute.xlu0 %608 }
 0x558   : > { %v594_v16 = vpop.permute.xlu0 %593 }
 0x559   : > { %v596_v17 = vadd.f32 %v594_v16, %v539_v15 }
 0x55b   : > { %598 = vst.msk [vmem:[#allocation4] sm:$0xff] %vm597_vm8, %v596_v17 }
 0x562   : > { %v605_v18 = vld [vmem:[#allocation4] sm:$0xff] }
 0x563   : > { %v611_v19 = vmul.f32 %v609_v13, %v605_v18 }
 0x565   : > { %v612_v20 = vpack.c.bf16 %v611_v19, %v611_v19 }
 0x567   : > { %614 = vst.msk [vmem:[%s301_s10] sm:$0xf] %vm613_vm9, %v612_v20 }
 0x569   : > { %v621_v21 = vpop.permute.xlu0 %620 }
 0x56a   : > { %v623_v22 = vmul.f32 %v621_v21, %v605_v18 }
 0x56c   : > { %v624_v23 = vpack.c.bf16 %v623_v22, %v623_v22 }
 0x56e   : > { %626 = vst.msk [vmem:[%s301_s10] sm:$0xf] %vm625_vm10, %v624_v23 }
 0x56f PF: > { %s14_s17 = sadd.s32 1, %s857_s17   ;;  %s977_s15 = smov %s853_s16 }
 0x570   : > { %p11_p5 = scmp.ge.s32.totalorder %s14_s17, 4   ;;  %s978_s16 = smov %s980_s18 }
 0x572   :  { %13 = sbr.rel (!%p11_p5) target bundleno = 2 (0x2), region = 83 }

// kernel: bert_token_classification_forward.17
= control target key start
LH: loop header
LB: loop body
LE: loop exit
PB: predicated region body
PF: predicated region fallthrough
CT: control target
= control target key end

     0   :  { %vm19_vm0 = vcmask 523264   ;;  %v165_v0 = vmov 0.0   ;;  %vm166_vm1 = vmmov 0   ;;  %vm47_vm2 = vcmask 261120   ;;  %s209_s1 = inlined_call_operand.vmem [shape: bf16[32,64], index: 1, kind: input, shape index: {}]   ;;  %s210_s0 = inlined_call_operand.vmem [shape: bf16[16,32], index: 0, kind: input, shape index: {}]   ;;  %s211_s2 = inlined_call_operand.vmem [shape: f32[1,64], index: 2, kind: input, shape index: {}]   ;;  %s212_s3 = inlined_call_operand.vmem [shape: bf16[16,64], index: 3, kind: output, shape index: {}]  }
   0x1   :  { %148 = vmatprep.subr.bf16.mxu0 %v165_v0  ;;  %v158_v1 = vld [vmem:[%s209_s1] sm:$0xff]   ;;  %152 = vmatprep.mubr.msk.bf16.mxu0 %vm166_vm1, %v165_v0  ;;  %20 = vst.msk [vmem:[#allocation2] sm:$0xff] %vm19_vm0, %v165_v0  ;;  %21 = vst.msk [vmem:[#allocation2 + $0x8] sm:$0xff] %vm19_vm0, %v165_v0  ;;  %v159_v2 = vld [vmem:[%s209_s1 + $0x8] sm:$0xff]   ;;  %vm129_vm3 = vcmask 519168  }
   0x2   :  { %149 = vmatpush3.bf16.msra.mxu0 %v158_v1  ;;  %v160_v3 = vld [vmem:[%s210_s0] sm:$0xff]  }
   0x3   :  { %150 = vmatprep.subr.bf16.mxu0 %v165_v0  ;;  %v140_v12 = vld [vmem:[%s211_s2] ss:$0 sm:$0xff] }
   0x6   :  { %151 = vmatpush3.bf16.msra.mxu0 %v159_v2 }
   0x8   :  { %v22_v4 = vld [vmem:[#allocation2] sm:$0xff]  ;;  %v23_v6 = vld [vmem:[#allocation2 + $0x8] sm:$0xff] }
   0x9   :  { %153 = vmatmul.mubr.msk.bf16.vlgmr.msra.gmra.mrb[0].mxu0 %vm47_vm2, %v160_v3 }
  0xdc   :  { %v85_v5 = vpop.f32.mrb[0].mxu0 }
  0xdd   :  { %v92_v7 = vadd.f32 %v85_v5, %v22_v4  ;;  %v154_v8 = vpop.f32.mrb[1].mxu0 }
  0xde   :  { %v88_v9 = vpop.f32.mrb[2].mxu0 }
  0xdf   :  { %95 = vst.msk [vmem:[#allocation2] sm:$0xff] %vm19_vm0, %v92_v7  ;;  %v93_v10 = vadd.f32 %v88_v9, %v23_v6  ;;  %v155_v11 = vpop.f32.mrb[3].mxu0 }
  0xe1   :  { %96 = vst.msk [vmem:[#allocation2 + $0x8] sm:$0xff] %vm19_vm0, %v93_v10 }
  0xe6   :  { %v100_v13 = vld [vmem:[#allocation2] sm:$0xff] }
  0xe7   :  { %v109_v14 = vadd.f32 %v140_v12, %v100_v13 }
  0xe8   :  { %v101_v15 = vld [vmem:[#allocation2 + $0x8] sm:$0xff] }
  0xe9   :  { %v113_v16 = vmul.f32 0.70710677, %v109_v14  ;;  %v110_v17 = vadd.f32 %v140_v12, %v101_v15  ;;  %v111_v20 = vmul.f32 0.5, %v109_v14 }
  0xeb   :  { %161 = verf.f32 %v113_v16  ;;  %v114_v18 = vmul.f32 0.70710677, %v110_v17  ;;  %v112_v24 = vmul.f32 0.5, %v110_v17 }
  0xed   :  { %163 = verf.f32 %v114_v18 }
  0xf5   :  { %v162_v19 = vpop.eup %161 }
  0xf6   :  { %v117_v21 = vadd.f32 1.0, %v162_v19 }
  0xf7   :  { %v164_v22 = vpop.eup %163 }
  0xf8   :  { %v119_v23 = vmul.f32 %v117_v21, %v111_v20  ;;  %v118_v25 = vadd.f32 1.0, %v164_v22 }
  0xfa   :  { %v143_v26 = vpack.c.bf16 %v119_v23, %v119_v23  ;;  %v120_v27 = vmul.f32 %v118_v25, %v112_v24 }
  0xfc   :  { %130 = vst.msk [vmem:[%s212_s3] sm:$0xf] %vm129_vm3, %v143_v26  ;;  %v144_v28 = vpack.c.bf16 %v120_v27, %v120_v27 }
  0xfe   :  { %131 = vst.msk [vmem:[%s212_s3 + $0x4] sm:$0xf] %vm129_vm3, %v144_v28 }

// kernel: bert_token_classification_forward.24
= control target key start
LH: loop header
LB: loop body
LE: loop exit
PB: predicated region body
PF: predicated region fallthrough
CT: control target
= control target key end

     0   :  { %v136_v0 = vmov 0.0   ;;  %vm137_vm0 = vmmov 0   ;;  %vm46_vm1 = vcmask 261120   ;;  %s176_s1 = inlined_call_operand.vmem [shape: bf16[32,128], index: 1, kind: input, shape index: {}]   ;;  %s177_s0 = inlined_call_operand.vmem [shape: bf16[16,32], index: 0, kind: input, shape index: {}]   ;;  %s178_s2 = inlined_call_operand.vmem [shape: f32[1,128], index: 2, kind: input, shape index: {}]   ;;  %s179_s3 = inlined_call_operand.vmem [shape: f32[16,128], index: 3, kind: output, shape index: {}]  }
   0x1   :  { %123 = vmatprep.subr.bf16.mxu0 %v136_v0  ;;  %v133_v1 = vld [vmem:[%s176_s1] sm:$0xff]   ;;  %127 = vmatprep.mubr.msk.bf16.mxu0 %vm137_vm0, %v136_v0  ;;  %v134_v2 = vld [vmem:[%s176_s1 + $0x8] sm:$0xff]  }
   0x2   :  { %124 = vmatpush3.bf16.msra.mxu0 %v133_v1  ;;  %v135_v3 = vld [vmem:[%s177_s0] sm:$0xff]  }
   0x3   :  { %125 = vmatprep.subr.bf16.mxu0 %v136_v0  ;;  %v119_v4 = vld [vmem:[%s178_s2] ss:$0 sm:$0xff] }
   0x6   :  { %126 = vmatpush3.bf16.msra.mxu0 %v134_v2 }
   0x9   :  { %128 = vmatmul.mubr.msk.bf16.vlgmr.msra.gmra.mrb[0].mxu0 %vm46_vm1, %v135_v3 }
  0xdc   :  { %v84_v5 = vpop.f32.mrb[0].mxu0 }
  0xdd   :  { %v107_v6 = vadd.f32 %v119_v4, %v84_v5  ;;  %v129_v7 = vpop.f32.mrb[1].mxu0 }
  0xde   :  { %v87_v8 = vpop.f32.mrb[2].mxu0 }
  0xdf   :  { %109 = vst [vmem:[%s179_s3] sm:$0xff] %v107_v6  ;;  %v108_v9 = vadd.f32 %v119_v4, %v87_v8  ;;  %v130_v10 = vpop.f32.mrb[3].mxu0 }
  0xe1   :  { %110 = vst [vmem:[%s179_s3 + $0x8] sm:$0xff] %v108_v9 }

// kernel: bert_token_classification_forward.25
= control target key start
LH: loop header
LB: loop body
LE: loop exit
PB: predicated region body
PF: predicated region fallthrough
CT: control target
= control target key end

     0   :  { %v28_v0 = vlaneseq  ;;  %v174_v2 = vmov 0   ;;  %s236_s0 = inlined_call_operand.vmem [shape: f32[16,128], index: 0, kind: input, shape index: {}]   ;;  %s237_s1 = inlined_call_operand.vmem [shape: s32[16,1], index: 1, kind: input, shape index: {}]   ;;  %s238_s2 = inlined_call_operand.vmem [shape: f32[16,1], index: 2, kind: input, shape index: {}]   ;;  %s239_s3 = inlined_call_operand.hbm [shape: f32[1,1], index: 3, kind: output, shape index: {}]  }
   0x1   :  { %v24_v1 = vld [vmem:[%s237_s1] sm:$0xff]  ;;  %138 = vset.pattern.permute.xlu1 %v174_v2  ;;  %139 = vset.pattern.permute.xlu0 %v174_v2 }
   0x2   :  { %8 = vsyncpa [#allocation5], 0  ;;  %v22_v3 = vld [vmem:[%s236_s0] sm:$0xff]  ;;  %v29_v4 = vand.u32 127, %v28_v0  ;;  %54 = vperm.xlu1 %138, %v24_v1   ;;  %v25_v5 = vld [vmem:[%s237_s1 + $0x8] sm:$0xff]  ;;  %v175_v17 = vmov 0.0  }
   0x3   :  { %v23_v6 = vld [vmem:[%s236_s0 + $0x8] sm:$0xff]  ;;  %v26_v33 = vld [vmem:[%s238_s2] sm:$0xff]  ;;  %vm76_vm5 = vcmask 7168   ;;  %vm19_vm6 = vcmask 0   ;;  %s176_s23 = smov [#allocation4]  }
   0x4   :  { %vm30_vm0 = vcmp.lt.s32.totalorder %v29_v4, 18  ;;  %v27_v35 = vld [vmem:[%s238_s2 + $0x8] sm:$0xff]  ;;  %v94_v42 = vsel %vm76_vm5, %v26_v33, 0.0  ;;  %20 = vst.msk [vmem:[#allocation2] sm:$0x1] %vm19_vm6, %v175_v17  ;;  %s123_s24 = sshll.u32 %s176_s23, 4  ;;  %s124_s24 = int_to_ptr.vmem [resolvable:$true] %s123_s24 }
   0x5   :  { %v31_v7 = vsel %vm30_vm0, %v22_v3, -1e+30  ;;  %v32_v8 = vsel %vm30_vm0, %v23_v6, -1e+30  ;;  %v95_v43 = vsel %vm76_vm5, %v27_v35, 0.0  ;;  %s150_s25 = scalar_lea.vmem %s124_s24, 16  ;;  %p155_p1 = scmp.lt.s32.totalorder %s124_s24, %s124_s24 }
   0x6   :  { %33 = vmax.xlane.f32.xlu0 %v31_v7  ;;  %57 = vperm.xlu1 %138, %v25_v5   ;;  %v96_v45 = vadd.f32 %v95_v43, %v94_v42  ;;  %21 = vst.msk [vmem:[#allocation3] sm:$0x1] %vm19_vm6, %v175_v17  ;;  %p151_p0 = scmp.ne.s32.totalorder %s124_s24, %s150_s25  ;;  %s154_s26 = scalar_lea.vmem %s124_s24, 32 }
   0x7   :  { %p156_p2 = scmp.lt.s32.totalorder %s154_s26, %s150_s25 }
   0x9   :  { %p157_p3 = por %p156_p2, %p155_p1 }
   0xa   :  { %35 = vmax.xlane.f32.xlu0 %v32_v8 }
   0xb   :  { %v75_v60 = vld [vmem:[#allocation2] sm:$0x1]  ;;  %p158_p4 = pnand %p157_p3, %p151_p0 }
   0xd   :  { %v93_v63 = vld [vmem:[#allocation3] sm:$0x1] }
  0x81   :  { %v55_v11 = vpop.permute.xlu1 %54 }
  0x82   :  { %vm59_vm1 = vcmp.eq.s32.totalorder %v29_v4, %v55_v11 }
  0x83   :  { %vm61_vm2 = vmand %vm59_vm1, %vm30_vm0 }
  0x84   :  { %v63_v18 = vsel %vm61_vm2, 1.0, %v175_v17 }
  0x85   :  { %v58_v16 = vpop.permute.xlu1 %57  ;;  %v65_v20 = vmul.f32 %v63_v18, %v22_v3 }
  0x86   :  { %vm60_vm3 = vcmp.eq.s32.totalorder %v29_v4, %v58_v16 }
  0x87   :  { %vm62_vm4 = vmand %vm60_vm3, %vm30_vm0 }
  0x88   :  { %v64_v21 = vsel %vm62_vm4, 1.0, %v175_v17 }
  0x89   :  { %v66_v23 = vmul.f32 %v64_v21, %v23_v6 }
  0x93   :  { %v34_v9 = vpop.xlane.xlu0 %33 }
  0x94   :  { %v37_v10 = vsub.f32 %v31_v7, %v34_v9 }
  0x96   :  { %v39_v12 = vmul.f32 1.442695, %v37_v10 }
  0x97   :  { %v36_v13 = vpop.xlane.xlu0 %35 }
  0x98   :  { %140 = vpow2.f32 %v39_v12  ;;  %v38_v14 = vsub.f32 %v32_v8, %v36_v13 }
  0x9a   :  { %v41_v15 = vmul.f32 1.442695, %v38_v14 }
  0x9c   :  { %142 = vpow2.f32 %v41_v15 }
  0xa2   :  { %v141_v19 = vpop.eup %140 }
  0xa3   :  { %43 = vadd.xlane.f32.xlu0 %v141_v19 }
  0xa6   :  { %v143_v22 = vpop.eup %142 }
  0xa7   :  { %45 = vadd.xlane.f32.xlu1 %v143_v22  ;;  %67 = vadd.xlane.f32.xlu0 %v65_v20 }
  0xab   :  { %69 = vadd.xlane.f32.xlu0 %v66_v23 }
 0x130   :  { %v44_v24 = vpop.xlane.xlu0 %43 }
 0x131   :  { %144 = vlog2.f32 %v44_v24 }
 0x134   :  { %v46_v25 = vpop.xlane.xlu1 %45  ;;  %v68_v28 = vpop.xlane.xlu0 %67 }
 0x135   :  { %146 = vlog2.f32 %v46_v25 }
 0x138   :  { %v70_v36 = vpop.xlane.xlu0 %69 }
 0x13b   :  { %v145_v26 = vpop.eup %144 }
 0x13c   :  { %v48_v27 = vmul.f32 0.6931472, %v145_v26 }
 0x13e   :  { %v51_v29 = vadd.f32 %v48_v27, %v34_v9 }
 0x13f   :  { %v147_v30 = vpop.eup %146 }
 0x140   :  { %v50_v31 = vmul.f32 0.6931472, %v147_v30  ;;  %v71_v32 = vsub.f32 %v51_v29, %v68_v28 }
 0x142   :  { %v52_v34 = vadd.f32 %v50_v31, %v36_v13  ;;  %v73_v37 = vmul.f32 %v71_v32, %v26_v33 }
 0x144   :  { %v72_v38 = vsub.f32 %v52_v34, %v70_v36  ;;  %v77_v40 = vsel %vm76_vm5, %v73_v37, 0.0 }
 0x146   :  { %v74_v39 = vmul.f32 %v72_v38, %v27_v35 }
 0x148   :  { %v78_v41 = vsel %vm76_vm5, %v74_v39, 0.0 }
 0x149   :  { %v79_v44 = vadd.f32 %v78_v41, %v77_v40 }
 0x14b   :  { %80 = vadd.xlane.f32.xlu0 %v79_v44 }
 0x14f   :  { %97 = vadd.xlane.f32.xlu0 %v96_v45 }
 0x1d8   :  { %v81_v46 = vpop.xlane.xlu0 %80 }
 0x1d9   :  { %v82_v47 = vrot.slane %v81_v46, 4 }
 0x1db   :  { %v83_v48 = vadd.f32 %v82_v47, %v81_v46 }
 0x1dc   :  { %v98_v49 = vpop.xlane.xlu0 %97 }
 0x1dd   :  { %v84_v50 = vrot.slane %v83_v48, 2  ;;  %v99_v51 = vrot.slane %v98_v49, 4 }
 0x1df   :  { %v100_v52 = vadd.f32 %v99_v51, %v98_v49  ;;  %v85_v53 = vadd.f32 %v84_v50, %v83_v48 }
 0x1e1   :  { %v101_v54 = vrot.slane %v100_v52, 2  ;;  %v86_v55 = vrot.slane %v85_v53, 1 }
 0x1e3   :  { %v102_v56 = vadd.f32 %v101_v54, %v100_v52  ;;  %v87_v57 = vadd.f32 %v86_v55, %v85_v53 }
 0x1e5   :  { %131 = vpush %v87_v57  ;;  %v103_v58 = vrot.slane %v102_v56, 1 }
 0x1e7   :  { %v104_v59 = vadd.f32 %v103_v58, %v102_v56 }
 0x1e9   :  { %133 = vpush %v104_v59 }
 0x216   :  { %s132_s2 = spop %131 }
 0x217   :  { %v89_v61 = vstv %s132_s2 }
 0x218   :  { %v90_v62 = vadd.f32 %v89_v61, %v75_v60 }
 0x21a   :  { %92 = vst.msk [vmem:[#allocation2] sm:$0x1] %vm19_vm6, %v90_v62  ;;  %s134_s22 = spop %133 }
 0x21b   :  { %v106_v0 = vstv %s134_s22 }
 0x21c   :  { %v107_v1 = vadd.f32 %v106_v0, %v93_v63 }
 0x21e   :  { %108 = vst.msk [vmem:[#allocation3] sm:$0x1] %vm19_vm6, %v107_v1 }
 0x221   :  { %v112_v4 = vld [vmem:[#allocation2] sm:$0x1] }
 0x225   :  { %v113_v2 = vld [vmem:[#allocation3] sm:$0x1] }
 0x226   :  { %148 = vrcp.f32 %v113_v2 }
 0x230   :  { %v149_v3 = vpop.eup %148 }
 0x231   :  { %v115_v5 = vmul.f32 %v149_v3, %v112_v4 }
 0x233   :  { %116 = vst.msk [vmem:[#allocation4] sm:$0x1] %vm19_vm6, %v115_v5 }
 0x234   :  { %161 = shalt.err (!%p158_p4)
}
 0x235   :  { %s162_s29 = scalar_lea.hbm %s239_s3, 16 }
 0x236   :  { %p163_p5 = scmp.ne.s32.totalorder %s239_s3, %s162_s29  ;;  %p166_p6 = scmp.lt.u32.totalorder %s162_s29, %s239_s3 }
 0x238   :  { %p168_p7 = pnand %p166_p6, %p163_p5 }
 0x23a   :  { %171 = shalt.err (!%p168_p7)
}
 0x23b   :  { %126 = dma.vmem_to_hbm [thread:$0]  %s124_s24, 16, %s239_s3, [#allocation5]  }
 0x23c   :  { %172 = dma.done.wait [#allocation5], 16  }
 0x23d   :  { %173 = vsyncadd [#allocation5], 4294967280 }
 0x23e   :  { %130 = vsyncpa [#allocation5], 1 }

// kernel: bert_token_classification_forward.18
= control target key start
LH: loop header
LB: loop body
LE: loop exit
PB: predicated region body
PF: predicated region fallthrough
CT: control target
= control target key end

     0   :  { %vm28_vm0 = vcmask 261120   ;;  %v247_v0 = vmov 0.0   ;;  %vm248_vm1 = vmmov 0   ;;  %vm72_vm2 = vcmask 523264   ;;  %s325_s1 = inlined_call_operand.vmem [shape: bf16[64,32], index: 1, kind: input, shape index: {}]   ;;  %s326_s0 = inlined_call_operand.vmem [shape: bf16[16,64], index: 0, kind: input, shape index: {}]   ;;  %s327_s3 = inlined_call_operand.vmem [shape: bf16[16,32], index: 3, kind: input, shape index: {}]   ;;  %s328_s2 = inlined_call_operand.vmem [shape: f32[1,32], index: 2, kind: input, shape index: {}]   ;;  %s329_s4 = inlined_call_operand.vmem [shape: f32[1,32], index: 4, kind: input, shape index: {}]   ;;  %s330_s5 = inlined_call_operand.vmem [shape: f32[1,32], index: 5, kind: input, shape index: {}]   ;;  %s331_s6 = inlined_call_operand.vmem [shape: bf16[16,32], index: 6, kind: output, shape index: {}]  }
   0x1   :  { %224 = vmatprep.subr.bf16.mxu0 %v247_v0  ;;  %v238_v1 = vld [vmem:[%s325_s1] sm:$0xff]   ;;  %232 = vmatprep.mubr.msk.bf16.mxu0 %vm248_vm1, %v247_v0  ;;  %29 = vst.msk [vmem:[#allocation2] sm:$0xff] %vm28_vm0, %v247_v0  ;;  %30 = vst.msk [vmem:[#allocation2 + $0x8] sm:$0xff] %vm28_vm0, %v247_v0  ;;  %v239_v2 = vld [vmem:[%s325_s1 + $0x8] sm:$0xff]   ;;  %vm195_vm3 = vcmask 257024  }
   0x2   :  { %225 = vmatpush3.bf16.msra.mxu0 %v238_v1  ;;  %v240_v3 = vld [vmem:[%s325_s1 + $0x10] sm:$0xff]   ;;  %v241_v4 = vld [vmem:[%s325_s1 + $0x18] sm:$0xff]   ;;  %v242_v5 = vld [vmem:[%s326_s0] sm:$0xff]  }
   0x3   :  { %226 = vmatprep.subr.bf16.mxu0 %v247_v0  ;;  %v216_v14 = vld [vmem:[%s327_s3] sm:$0xff]  }
   0x4   :  { %v208_v15 = vld [vmem:[%s328_s2] ss:$0 sm:$0xff]  ;;  %v217_v16 = vunpack.c.l.bf16 %v216_v14  ;;  %v218_v19 = vunpack.c.h.bf16 %v216_v14 }
   0x5   :  { %v209_v43 = vld [vmem:[%s329_s4] ss:$0 sm:$0xff] }
   0x6   :  { %227 = vmatpush3.bf16.msra.mxu0 %v239_v2  ;;  %v210_v45 = vld [vmem:[%s330_s5] ss:$0 sm:$0xff] }
   0x7   :  { %228 = vmatprep.subr.bf16.mxu0 %v247_v0 }
   0x8   :  { %v31_v6 = vld [vmem:[#allocation2] sm:$0xff]  ;;  %v32_v8 = vld [vmem:[#allocation2 + $0x8] sm:$0xff] }
   0xa   :  { %229 = vmatpush3.bf16.msra.mxu0 %v240_v3 }
   0xb   :  { %230 = vmatprep.subr.bf16.mxu0 %v247_v0 }
   0xe   :  { %231 = vmatpush3.bf16.msra.mxu0 %v241_v4 }
  0x11   :  { %233 = vmatmul.mubr.msk.bf16.vlgmr.msra.gmra.mrb[0].mxu0 %vm72_vm2, %v242_v5 }
  0xe4   :  { %v110_v7 = vpop.f32.mrb[0].mxu0 }
  0xe5   :  { %v117_v9 = vadd.f32 %v110_v7, %v31_v6  ;;  %v234_v10 = vpop.f32.mrb[1].mxu0 }
  0xe6   :  { %v113_v11 = vpop.f32.mrb[2].mxu0 }
  0xe7   :  { %120 = vst.msk [vmem:[#allocation2] sm:$0xff] %vm28_vm0, %v117_v9  ;;  %v118_v12 = vadd.f32 %v113_v11, %v32_v8  ;;  %v235_v13 = vpop.f32.mrb[3].mxu0 }
  0xe9   :  { %121 = vst.msk [vmem:[#allocation2 + $0x8] sm:$0xff] %vm28_vm0, %v118_v12 }
  0xee   :  { %v125_v17 = vld [vmem:[#allocation2] sm:$0xff] }
  0xef   :  { %v134_v18 = vadd.f32 %v208_v15, %v125_v17 }
  0xf0   :  { %v126_v20 = vld [vmem:[#allocation2 + $0x8] sm:$0xff] }
  0xf1   :  { %v140_v21 = vadd.f32 %v217_v16, %v134_v18  ;;  %v135_v22 = vadd.f32 %v208_v15, %v126_v20 }
  0xf3   :  { %v144_v23 = vsel %vm28_vm0, %v140_v21, 0.0  ;;  %v141_v24 = vadd.f32 %v218_v19, %v135_v22 }
  0xf4   :  { %145 = vadd.xlane.f32.xlu0 %v144_v23 }
  0xf5   :  { %v147_v25 = vsel %vm28_vm0, %v141_v24, 0.0 }
  0xf8   :  { %148 = vadd.xlane.f32.xlu0 %v147_v25 }
 0x181   :  { %v146_v26 = vpop.xlane.xlu0 %145 }
 0x182   :  { %v151_v27 = vmul.f32 0.03125, %v146_v26 }
 0x184   :  { %v153_v28 = vsub.f32 %v140_v21, %v151_v27 }
 0x185   :  { %v149_v29 = vpop.xlane.xlu0 %148 }
 0x186   :  { %v152_v30 = vmul.f32 0.03125, %v149_v29  ;;  %v155_v31 = vmul.f32 %v153_v28, %v153_v28 }
 0x188   :  { %v154_v32 = vsub.f32 %v141_v24, %v152_v30  ;;  %v157_v33 = vsel %vm28_vm0, %v155_v31, 0.0 }
 0x189   :  { %158 = vadd.xlane.f32.xlu1 %v157_v33 }
 0x18a   :  { %v156_v34 = vmul.f32 %v154_v32, %v154_v32 }
 0x18c   :  { %v160_v35 = vsel %vm28_vm0, %v156_v34, 0.0 }
 0x18d   :  { %161 = vadd.xlane.f32.xlu1 %v160_v35 }
 0x216   :  { %v159_v36 = vpop.xlane.xlu1 %158 }
 0x217   :  { %v163_v37 = vmul.f32 0.03125, %v159_v36 }
 0x219   :  { %v165_v38 = vadd.f32 1e-12, %v163_v37 }
 0x21a   :  { %v162_v39 = vpop.xlane.xlu1 %161 }
 0x21b   :  { %243 = vrsqrt.f32 %v165_v38  ;;  %v164_v40 = vmul.f32 0.03125, %v162_v39 }
 0x21d   :  { %v166_v41 = vadd.f32 1e-12, %v164_v40 }
 0x21f   :  { %245 = vrsqrt.f32 %v166_v41 }
 0x225   :  { %v244_v42 = vpop.eup %243 }
 0x226   :  { %v169_v44 = vmul.f32 %v244_v42, %v153_v28 }
 0x228   :  { %v177_v46 = vmul.f32 %v209_v43, %v169_v44 }
 0x229   :  { %v246_v47 = vpop.eup %245 }
 0x22a   :  { %v185_v48 = vadd.f32 %v210_v45, %v177_v46  ;;  %v170_v49 = vmul.f32 %v246_v47, %v154_v32 }
 0x22c   :  { %v213_v50 = vpack.c.bf16 %v185_v48, %v185_v48  ;;  %v178_v51 = vmul.f32 %v209_v43, %v170_v49 }
 0x22e   :  { %196 = vst.msk [vmem:[%s331_s6] sm:$0xf] %vm195_vm3, %v213_v50  ;;  %v186_v52 = vadd.f32 %v210_v45, %v178_v51 }
 0x230   :  { %v214_v53 = vpack.c.bf16 %v186_v52, %v186_v52 }
 0x232   :  { %197 = vst.msk [vmem:[%s331_s6 + $0x4] sm:$0xf] %vm195_vm3, %v214_v53 }

</bundles_post_ra>
